<compile_context>
chip_gen: v7x
topology: tpu7x:2x2x1
jax: 0.10.0
libtpu: 0.0.40
codegen_flags: <defaults>
</compile_context>

<pallas_src>
import math
from functools import partial

import numpy as np
import jax
import jax.numpy as jnp
from jax import lax
from jax.experimental import pallas as pl
from jax.experimental.pallas import tpu as pltpu


def _layernorm_f32(v, g, b, eps):
    # one-pass stats: mean and mean-of-squares (single sweep over lane axis)
    m = jnp.mean(v, axis=-1, keepdims=True)
    m2 = jnp.mean(v * v, axis=-1, keepdims=True)
    var = m2 - m * m
    return (v - m) * lax.rsqrt(var + eps) * g + b


def block_kernel(x_ref, g1_ref, b1_ref, wqkv_ref, bqkv_ref, wproj_ref, bproj_ref,
                 g2_ref, b2_ref, w1_ref, bf1_ref, w2_ref, bf2_ref, o_ref,
                 *, num_heads, head_dim, scale, eps):
    f32 = jnp.float32
    bf16 = jnp.bfloat16
    C = num_heads * head_dim

    x = x_ref[...].astype(f32)                                           # [N, C]

    # ---------------- attention branch: LN1 -> QKV -> MHSA -> proj ----------
    h = _layernorm_f32(x, g1_ref[...].astype(f32), b1_ref[...].astype(f32), eps)

    # QKV projection: bf16 operands on the MXU, f32 accumulation
    qkv = jnp.dot(h.astype(bf16), wqkv_ref[...].astype(bf16),
                  preferred_element_type=f32) + bqkv_ref[...].astype(f32)  # [N, 3C]

    dn_qkt = (((1,), (1,)), ((), ()))        # contract last dims -> q @ k^T
    head_outs = []
    for hh in range(num_heads):              # static unrolled loop over heads
        lo = hh * head_dim
        q = qkv[:, lo:lo + head_dim].astype(bf16)
        k = qkv[:, C + lo:C + lo + head_dim].astype(bf16)
        v = qkv[:, 2 * C + lo:2 * C + lo + head_dim].astype(bf16)
        s = lax.dot_general(q, k, dn_qkt, preferred_element_type=f32) * scale  # [N, N]
        s = s - jnp.max(s, axis=-1, keepdims=True)
        p = jnp.exp(s)
        p = p / jnp.sum(p, axis=-1, keepdims=True)                       # softmax, f32
        head_outs.append(jnp.dot(p.astype(bf16), v, preferred_element_type=f32))
    attn = jnp.concatenate(head_outs, axis=-1)                           # [N, C]

    proj = jnp.dot(attn.astype(bf16), wproj_ref[...].astype(bf16),
                   preferred_element_type=f32) + bproj_ref[...].astype(f32)
    x = x + proj                                                         # residual 1

    # ---------------- MLP branch: LN2 -> fc1 -> GELU(exact) -> fc2 ----------
    h2 = _layernorm_f32(x, g2_ref[...].astype(f32), b2_ref[...].astype(f32), eps)
    z = jnp.dot(h2.astype(bf16), w1_ref[...].astype(bf16),
                preferred_element_type=f32) + bf1_ref[...].astype(f32)   # [N, H]
    z = 0.5 * z * (1.0 + lax.erf(z * np.float32(1.0 / math.sqrt(2.0))))  # exact GELU
    y = jnp.dot(z.astype(bf16), w2_ref[...].astype(bf16),
                preferred_element_type=f32) + bf2_ref[...].astype(f32)   # [N, C]
    x = x + y                                                            # residual 2

    # full-block, row-0-aligned, lane-dense store
    o_ref[...] = x.astype(o_ref.dtype)


def transformer_block(x, params, *, num_heads, eps=1e-6):
    """x: [B, N, C] -> [B, N, C].  Weights are in x @ W ([in, out]) layout."""
    B, N, C = x.shape
    assert C % num_heads == 0
    head_dim = C // num_heads
    scale = head_dim ** -0.5
    H = params["w_fc1"].shape[1]

    row = lambda v: v.reshape(1, -1)          # biases/gains as [1, dim] 2-D rows
    operands = (
        x,
        row(params["ln1_g"]), row(params["ln1_b"]),
        params["w_qkv"], row(params["b_qkv"]),
        params["w_proj"], row(params["b_proj"]),
        row(params["ln2_g"]), row(params["ln2_b"]),
        params["w_fc1"], row(params["b_fc1"]),
        params["w_fc2"], row(params["b_fc2"]),
    )

    def rep(shape):                            # weights replicated across the grid
        return pl.BlockSpec(shape, lambda b: (0, 0))

    in_specs = [
        pl.BlockSpec((None, N, C), lambda b: (b, 0, 0)),   # x, one batch element
        rep((1, C)), rep((1, C)),                          # ln1 gamma / beta
        rep((C, 3 * C)), rep((1, 3 * C)),                  # qkv weight / bias
        rep((C, C)), rep((1, C)),                          # proj weight / bias
        rep((1, C)), rep((1, C)),                          # ln2 gamma / beta
        rep((C, H)), rep((1, H)),                          # fc1 weight / bias
        rep((H, C)), rep((1, C)),                          # fc2 weight / bias
    ]

    return pl.pallas_call(
        partial(block_kernel, num_heads=num_heads, head_dim=head_dim,
                scale=scale, eps=eps),
        out_shape=jax.ShapeDtypeStruct((B, N, C), x.dtype),
        grid_spec=pltpu.PrefetchScalarGridSpec(
            num_scalar_prefetch=0,
            grid=(B,),
            in_specs=in_specs,
            out_specs=pl.BlockSpec((None, N, C), lambda b: (b, 0, 0)),
        ),
        compiler_params=pltpu.CompilerParams(
            dimension_semantics=("parallel",)),
    )(*operands)


def transformer_block_reference(x, params, *, num_heads, eps=1e-6):
    """Pure-JAX reference with the same mixed precision (bf16 MXU / f32 acc)."""
    B, N, C = x.shape
    hd = C // num_heads
    scale = hd ** -0.5
    bf16 = jnp.bfloat16

    def ln(v, g, b):
        m = v.mean(-1, keepdims=True)
        var = ((v - m) ** 2).mean(-1, keepdims=True)
        return (v - m) / jnp.sqrt(var + eps) * g + b

    h = ln(x, params["ln1_g"], params["ln1_b"])
    qkv = jnp.dot(h.astype(bf16), params["w_qkv"].astype(bf16),
                  preferred_element_type=jnp.float32) + params["b_qkv"]
    qkv = qkv.reshape(B, N, 3, num_heads, hd).transpose(2, 0, 3, 1, 4)
    q, k, v = qkv[0], qkv[1], qkv[2]                                   # [B, nh, N, hd]
    s = jnp.einsum("bhqd,bhkd->bhqk", q.astype(bf16), k.astype(bf16),
                   preferred_element_type=jnp.float32) * scale
    s = s - s.max(-1, keepdims=True)
    p = jnp.exp(s)
    p = p / p.sum(-1, keepdims=True)
    o = jnp.einsum("bhqk,bhkd->bhqd", p.astype(bf16), v.astype(bf16),
                   preferred_element_type=jnp.float32)
    o = o.transpose(0, 2, 1, 3).reshape(B, N, C)
    x = x + jnp.dot(o.astype(bf16), params["w_proj"].astype(bf16),
                    preferred_element_type=jnp.float32) + params["b_proj"]

    h2 = ln(x, params["ln2_g"], params["ln2_b"])
    z = jnp.dot(h2.astype(bf16), params["w_fc1"].astype(bf16),
                preferred_element_type=jnp.float32) + params["b_fc1"]
    z = 0.5 * z * (1.0 + lax.erf(z * np.float32(1.0 / math.sqrt(2.0))))
    y = jnp.dot(z.astype(bf16), params["w_fc2"].astype(bf16),
                preferred_element_type=jnp.float32) + params["b_fc2"]
    return x + y


if __name__ == "__main__":
    # small shapes implied by Block.forward: [B, N, dim]; dim multiple of 128
    # for lane-dense stores.
    B, N, C = 2, 16, 128
    num_heads = 4
    mlp_ratio = 4.0
    H = int(C * mlp_ratio)

    key = jax.random.PRNGKey(0)
    ks = jax.random.split(key, 12)
    x = jax.random.normal(ks[0], (B, N, C), jnp.float32)
    params = {
        "ln1_g": 1.0 + 0.1 * jax.random.normal(ks[1], (C,), jnp.float32),
        "ln1_b": 0.1 * jax.random.normal(ks[2], (C,), jnp.float32),
        "w_qkv": 0.05 * jax.random.normal(ks[3], (C, 3 * C), jnp.float32),
        "b_qkv": jnp.zeros((3 * C,), jnp.float32),     # qkv_bias=False (default)
        "w_proj": 0.05 * jax.random.normal(ks[4], (C, C), jnp.float32),
        "b_proj": 0.05 * jax.random.normal(ks[5], (C,), jnp.float32),
        "ln2_g": 1.0 + 0.1 * jax.random.normal(ks[6], (C,), jnp.float32),
        "ln2_b": 0.1 * jax.random.normal(ks[7], (C,), jnp.float32),
        "w_fc1": 0.05 * jax.random.normal(ks[8], (C, H), jnp.float32),
        "b_fc1": 0.05 * jax.random.normal(ks[9], (H,), jnp.float32),
        "w_fc2": 0.05 * jax.random.normal(ks[10], (H, C), jnp.float32),
        "b_fc2": 0.05 * jax.random.normal(ks[11], (C,), jnp.float32),
    }

    out = transformer_block(x, params, num_heads=num_heads)
    out = jax.block_until_ready(out)

    ref = transformer_block_reference(x, params, num_heads=num_heads)
    assert out.shape == (B, N, C), out.shape
    np.testing.assert_allclose(np.asarray(out), np.asarray(ref),
                               rtol=2e-3, atol=2e-3)
    print("KERNEL_OK")
</pallas_src>

<mosaic_0001>
module attributes {stable_mosaic.version = 11 : i64} {
  func.func @block_kernel(%arg0: i32, %arg1: memref<1x16x128xf32, #tpu.memory_space<vmem>>, %arg2: memref<1x128xf32, #tpu.memory_space<vmem>>, %arg3: memref<1x128xf32, #tpu.memory_space<vmem>>, %arg4: memref<128x384xf32, #tpu.memory_space<vmem>>, %arg5: memref<1x384xf32, #tpu.memory_space<vmem>>, %arg6: memref<128x128xf32, #tpu.memory_space<vmem>>, %arg7: memref<1x128xf32, #tpu.memory_space<vmem>>, %arg8: memref<1x128xf32, #tpu.memory_space<vmem>>, %arg9: memref<1x128xf32, #tpu.memory_space<vmem>>, %arg10: memref<128x512xf32, #tpu.memory_space<vmem>>, %arg11: memref<1x512xf32, #tpu.memory_space<vmem>>, %arg12: memref<512x128xf32, #tpu.memory_space<vmem>>, %arg13: memref<1x128xf32, #tpu.memory_space<vmem>>, %arg14: memref<1x16x128xf32, #tpu.memory_space<vmem>>) attributes {dimension_semantics = [#tpu.dimension_semantics<parallel>], iteration_bounds = array<i64: 2>, scalar_prefetch = 0 : i64, scratch_operands = 0 : i64, tpu.core_type = #tpu.core_type<tc>, window_params = [{transform_indices = @transform_0, window_bounds = array<i64: 1, 16, 128>}, {pipeline_mode = #tpu.pipeline_mode<synchronous>, transform_indices = @transform_1, window_bounds = array<i64: 1, 128>}, {pipeline_mode = #tpu.pipeline_mode<synchronous>, transform_indices = @transform_2, window_bounds = array<i64: 1, 128>}, {pipeline_mode = #tpu.pipeline_mode<synchronous>, transform_indices = @transform_3, window_bounds = array<i64: 128, 384>}, {pipeline_mode = #tpu.pipeline_mode<synchronous>, transform_indices = @transform_4, window_bounds = array<i64: 1, 384>}, {pipeline_mode = #tpu.pipeline_mode<synchronous>, transform_indices = @transform_5, window_bounds = array<i64: 128, 128>}, {pipeline_mode = #tpu.pipeline_mode<synchronous>, transform_indices = @transform_6, window_bounds = array<i64: 1, 128>}, {pipeline_mode = #tpu.pipeline_mode<synchronous>, transform_indices = @transform_7, window_bounds = array<i64: 1, 128>}, {pipeline_mode = #tpu.pipeline_mode<synchronous>, transform_indices = @transform_8, window_bounds = array<i64: 1, 128>}, {pipeline_mode = #tpu.pipeline_mode<synchronous>, transform_indices = @transform_9, window_bounds = array<i64: 128, 512>}, {pipeline_mode = #tpu.pipeline_mode<synchronous>, transform_indices = @transform_10, window_bounds = array<i64: 1, 512>}, {pipeline_mode = #tpu.pipeline_mode<synchronous>, transform_indices = @transform_11, window_bounds = array<i64: 512, 128>}, {pipeline_mode = #tpu.pipeline_mode<synchronous>, transform_indices = @transform_12, window_bounds = array<i64: 1, 128>}, {transform_indices = @transform_13, window_bounds = array<i64: 1, 16, 128>}]} {
    %c0 = arith.constant 0 : index
    %c0_0 = arith.constant 0 : index
    %c0_1 = arith.constant 0 : index
    %0 = vector.load %arg1[%c0, %c0_0, %c0_1] : memref<1x16x128xf32, #tpu.memory_space<vmem>>, vector<1x16x128xf32>
    %1 = vector.shape_cast %0 : vector<1x16x128xf32> to vector<16x128xf32>
    %c0_2 = arith.constant 0 : index
    %c0_3 = arith.constant 0 : index
    %2 = vector.load %arg2[%c0_2, %c0_3] : memref<1x128xf32, #tpu.memory_space<vmem>>, vector<1x128xf32>
    %c0_4 = arith.constant 0 : index
    %c0_5 = arith.constant 0 : index
    %3 = vector.load %arg3[%c0_4, %c0_5] : memref<1x128xf32, #tpu.memory_space<vmem>>, vector<1x128xf32>
    %cst = arith.constant dense<0.000000e+00> : vector<16xf32>
    %4 = vector.multi_reduction <add>, %1, %cst [1] : vector<16x128xf32> to vector<16xf32>
    %5 = vector.shape_cast %4 : vector<16xf32> to vector<16x1xf32>
    %cst_6 = arith.constant 1.280000e+02 : f32
    %6 = vector.broadcast %cst_6 : f32 to vector<16x1xf32>
    %7 = arith.divf %5, %6 : vector<16x1xf32>
    %8 = arith.mulf %1, %1 : vector<16x128xf32>
    %cst_7 = arith.constant dense<0.000000e+00> : vector<16xf32>
    %9 = vector.multi_reduction <add>, %8, %cst_7 [1] : vector<16x128xf32> to vector<16xf32>
    %10 = vector.shape_cast %9 : vector<16xf32> to vector<16x1xf32>
    %cst_8 = arith.constant 1.280000e+02 : f32
    %11 = vector.broadcast %cst_8 : f32 to vector<16x1xf32>
    %12 = arith.divf %10, %11 : vector<16x1xf32>
    %13 = arith.mulf %7, %7 : vector<16x1xf32>
    %14 = arith.subf %12, %13 : vector<16x1xf32>
    %15 = vector.broadcast %7 : vector<16x1xf32> to vector<16x128xf32>
    %16 = arith.subf %1, %15 : vector<16x128xf32>
    %cst_9 = arith.constant 9.99999997E-7 : f32
    %17 = vector.broadcast %cst_9 : f32 to vector<16x1xf32>
    %18 = arith.addf %14, %17 : vector<16x1xf32>
    %19 = math.rsqrt %18 : vector<16x1xf32>
    %20 = vector.broadcast %19 : vector<16x1xf32> to vector<16x128xf32>
    %21 = arith.mulf %16, %20 : vector<16x128xf32>
    %22 = vector.broadcast %2 : vector<1x128xf32> to vector<16x128xf32>
    %23 = arith.mulf %21, %22 : vector<16x128xf32>
    %24 = vector.broadcast %3 : vector<1x128xf32> to vector<16x128xf32>
    %25 = arith.addf %23, %24 : vector<16x128xf32>
    %26 = arith.truncf %25 : vector<16x128xf32> to vector<16x128xbf16>
    %c0_10 = arith.constant 0 : index
    %c0_11 = arith.constant 0 : index
    %27 = vector.load %arg4[%c0_10, %c0_11] : memref<128x384xf32, #tpu.memory_space<vmem>>, vector<128x384xf32>
    %28 = arith.truncf %27 : vector<128x384xf32> to vector<128x384xbf16>
    %cst_12 = arith.constant dense<0.000000e+00> : vector<16x384xf32>
    %29 = tpu.matmul %26, %28, %cst_12 {dimension_numbers = #tpu.dot_dimension_numbers<[1], [0], [0], [1], [0, 0, 1, 1], [], []>} : vector<16x128xbf16>, vector<128x384xbf16>, vector<16x384xf32> -> vector<16x384xf32>
    %c0_13 = arith.constant 0 : index
    %c0_14 = arith.constant 0 : index
    %30 = vector.load %arg5[%c0_13, %c0_14] : memref<1x384xf32, #tpu.memory_space<vmem>>, vector<1x384xf32>
    %31 = vector.broadcast %30 : vector<1x384xf32> to vector<16x384xf32>
    %32 = arith.addf %29, %31 : vector<16x384xf32>
    %33 = vector.extract_strided_slice %32 {offsets = [0, 0], sizes = [16, 32], strides = [1, 1]} : vector<16x384xf32> to vector<16x32xf32>
    %34 = arith.truncf %33 : vector<16x32xf32> to vector<16x32xbf16>
    %35 = vector.extract_strided_slice %32 {offsets = [0, 128], sizes = [16, 32], strides = [1, 1]} : vector<16x384xf32> to vector<16x32xf32>
    %36 = arith.truncf %35 : vector<16x32xf32> to vector<16x32xbf16>
    %37 = vector.extract_strided_slice %32 {offsets = [0, 256], sizes = [16, 32], strides = [1, 1]} : vector<16x384xf32> to vector<16x32xf32>
    %38 = arith.truncf %37 : vector<16x32xf32> to vector<16x32xbf16>
    %cst_15 = arith.constant dense<0.000000e+00> : vector<16x16xf32>
    %39 = tpu.matmul %34, %36, %cst_15 {dimension_numbers = #tpu.dot_dimension_numbers<[1], [1], [0], [0], [0, 0, 1, 0], [], []>} : vector<16x32xbf16>, vector<16x32xbf16>, vector<16x16xf32> -> vector<16x16xf32>
    %cst_16 = arith.constant 0.176776692 : f32
    %40 = vector.broadcast %cst_16 : f32 to vector<16x16xf32>
    %41 = arith.mulf %39, %40 : vector<16x16xf32>
    %cst_17 = arith.constant dense<0xFF800000> : vector<16xf32>
    %42 = vector.multi_reduction <maximumf>, %41, %cst_17 [1] : vector<16x16xf32> to vector<16xf32>
    %43 = vector.shape_cast %42 : vector<16xf32> to vector<16x1xf32>
    %44 = vector.broadcast %43 : vector<16x1xf32> to vector<16x16xf32>
    %45 = arith.subf %41, %44 : vector<16x16xf32>
    %46 = math.exp %45 : vector<16x16xf32>
    %cst_18 = arith.constant dense<0.000000e+00> : vector<16xf32>
    %47 = vector.multi_reduction <add>, %46, %cst_18 [1] : vector<16x16xf32> to vector<16xf32>
    %48 = vector.shape_cast %47 : vector<16xf32> to vector<16x1xf32>
    %49 = vector.broadcast %48 : vector<16x1xf32> to vector<16x16xf32>
    %50 = arith.divf %46, %49 : vector<16x16xf32>
    %51 = arith.truncf %50 : vector<16x16xf32> to vector<16x16xbf16>
    %cst_19 = arith.constant dense<0.000000e+00> : vector<16x32xf32>
    %52 = tpu.matmul %51, %38, %cst_19 {dimension_numbers = #tpu.dot_dimension_numbers<[1], [0], [0], [1], [0, 0, 1, 1], [], []>} : vector<16x16xbf16>, vector<16x32xbf16>, vector<16x32xf32> -> vector<16x32xf32>
    %53 = vector.extract_strided_slice %32 {offsets = [0, 32], sizes = [16, 32], strides = [1, 1]} : vector<16x384xf32> to vector<16x32xf32>
    %54 = arith.truncf %53 : vector<16x32xf32> to vector<16x32xbf16>
    %55 = vector.extract_strided_slice %32 {offsets = [0, 160], sizes = [16, 32], strides = [1, 1]} : vector<16x384xf32> to vector<16x32xf32>
    %56 = arith.truncf %55 : vector<16x32xf32> to vector<16x32xbf16>
    %57 = vector.extract_strided_slice %32 {offsets = [0, 288], sizes = [16, 32], strides = [1, 1]} : vector<16x384xf32> to vector<16x32xf32>
    %58 = arith.truncf %57 : vector<16x32xf32> to vector<16x32xbf16>
    %cst_20 = arith.constant dense<0.000000e+00> : vector<16x16xf32>
    %59 = tpu.matmul %54, %56, %cst_20 {dimension_numbers = #tpu.dot_dimension_numbers<[1], [1], [0], [0], [0, 0, 1, 0], [], []>} : vector<16x32xbf16>, vector<16x32xbf16>, vector<16x16xf32> -> vector<16x16xf32>
    %cst_21 = arith.constant 0.176776692 : f32
    %60 = vector.broadcast %cst_21 : f32 to vector<16x16xf32>
    %61 = arith.mulf %59, %60 : vector<16x16xf32>
    %cst_22 = arith.constant dense<0xFF800000> : vector<16xf32>
    %62 = vector.multi_reduction <maximumf>, %61, %cst_22 [1] : vector<16x16xf32> to vector<16xf32>
    %63 = vector.shape_cast %62 : vector<16xf32> to vector<16x1xf32>
    %64 = vector.broadcast %63 : vector<16x1xf32> to vector<16x16xf32>
    %65 = arith.subf %61, %64 : vector<16x16xf32>
    %66 = math.exp %65 : vector<16x16xf32>
    %cst_23 = arith.constant dense<0.000000e+00> : vector<16xf32>
    %67 = vector.multi_reduction <add>, %66, %cst_23 [1] : vector<16x16xf32> to vector<16xf32>
    %68 = vector.shape_cast %67 : vector<16xf32> to vector<16x1xf32>
    %69 = vector.broadcast %68 : vector<16x1xf32> to vector<16x16xf32>
    %70 = arith.divf %66, %69 : vector<16x16xf32>
    %71 = arith.truncf %70 : vector<16x16xf32> to vector<16x16xbf16>
    %cst_24 = arith.constant dense<0.000000e+00> : vector<16x32xf32>
    %72 = tpu.matmul %71, %58, %cst_24 {dimension_numbers = #tpu.dot_dimension_numbers<[1], [0], [0], [1], [0, 0, 1, 1], [], []>} : vector<16x16xbf16>, vector<16x32xbf16>, vector<16x32xf32> -> vector<16x32xf32>
    %73 = vector.extract_strided_slice %32 {offsets = [0, 64], sizes = [16, 32], strides = [1, 1]} : vector<16x384xf32> to vector<16x32xf32>
    %74 = arith.truncf %73 : vector<16x32xf32> to vector<16x32xbf16>
    %75 = vector.extract_strided_slice %32 {offsets = [0, 192], sizes = [16, 32], strides = [1, 1]} : vector<16x384xf32> to vector<16x32xf32>
    %76 = arith.truncf %75 : vector<16x32xf32> to vector<16x32xbf16>
    %77 = vector.extract_strided_slice %32 {offsets = [0, 320], sizes = [16, 32], strides = [1, 1]} : vector<16x384xf32> to vector<16x32xf32>
    %78 = arith.truncf %77 : vector<16x32xf32> to vector<16x32xbf16>
    %cst_25 = arith.constant dense<0.000000e+00> : vector<16x16xf32>
    %79 = tpu.matmul %74, %76, %cst_25 {dimension_numbers = #tpu.dot_dimension_numbers<[1], [1], [0], [0], [0, 0, 1, 0], [], []>} : vector<16x32xbf16>, vector<16x32xbf16>, vector<16x16xf32> -> vector<16x16xf32>
    %cst_26 = arith.constant 0.176776692 : f32
    %80 = vector.broadcast %cst_26 : f32 to vector<16x16xf32>
    %81 = arith.mulf %79, %80 : vector<16x16xf32>
    %cst_27 = arith.constant dense<0xFF800000> : vector<16xf32>
    %82 = vector.multi_reduction <maximumf>, %81, %cst_27 [1] : vector<16x16xf32> to vector<16xf32>
    %83 = vector.shape_cast %82 : vector<16xf32> to vector<16x1xf32>
    %84 = vector.broadcast %83 : vector<16x1xf32> to vector<16x16xf32>
    %85 = arith.subf %81, %84 : vector<16x16xf32>
    %86 = math.exp %85 : vector<16x16xf32>
    %cst_28 = arith.constant dense<0.000000e+00> : vector<16xf32>
    %87 = vector.multi_reduction <add>, %86, %cst_28 [1] : vector<16x16xf32> to vector<16xf32>
    %88 = vector.shape_cast %87 : vector<16xf32> to vector<16x1xf32>
    %89 = vector.broadcast %88 : vector<16x1xf32> to vector<16x16xf32>
    %90 = arith.divf %86, %89 : vector<16x16xf32>
    %91 = arith.truncf %90 : vector<16x16xf32> to vector<16x16xbf16>
    %cst_29 = arith.constant dense<0.000000e+00> : vector<16x32xf32>
    %92 = tpu.matmul %91, %78, %cst_29 {dimension_numbers = #tpu.dot_dimension_numbers<[1], [0], [0], [1], [0, 0, 1, 1], [], []>} : vector<16x16xbf16>, vector<16x32xbf16>, vector<16x32xf32> -> vector<16x32xf32>
    %93 = vector.extract_strided_slice %32 {offsets = [0, 96], sizes = [16, 32], strides = [1, 1]} : vector<16x384xf32> to vector<16x32xf32>
    %94 = arith.truncf %93 : vector<16x32xf32> to vector<16x32xbf16>
    %95 = vector.extract_strided_slice %32 {offsets = [0, 224], sizes = [16, 32], strides = [1, 1]} : vector<16x384xf32> to vector<16x32xf32>
    %96 = arith.truncf %95 : vector<16x32xf32> to vector<16x32xbf16>
    %97 = vector.extract_strided_slice %32 {offsets = [0, 352], sizes = [16, 32], strides = [1, 1]} : vector<16x384xf32> to vector<16x32xf32>
    %98 = arith.truncf %97 : vector<16x32xf32> to vector<16x32xbf16>
    %cst_30 = arith.constant dense<0.000000e+00> : vector<16x16xf32>
    %99 = tpu.matmul %94, %96, %cst_30 {dimension_numbers = #tpu.dot_dimension_numbers<[1], [1], [0], [0], [0, 0, 1, 0], [], []>} : vector<16x32xbf16>, vector<16x32xbf16>, vector<16x16xf32> -> vector<16x16xf32>
    %cst_31 = arith.constant 0.176776692 : f32
    %100 = vector.broadcast %cst_31 : f32 to vector<16x16xf32>
    %101 = arith.mulf %99, %100 : vector<16x16xf32>
    %cst_32 = arith.constant dense<0xFF800000> : vector<16xf32>
    %102 = vector.multi_reduction <maximumf>, %101, %cst_32 [1] : vector<16x16xf32> to vector<16xf32>
    %103 = vector.shape_cast %102 : vector<16xf32> to vector<16x1xf32>
    %104 = vector.broadcast %103 : vector<16x1xf32> to vector<16x16xf32>
    %105 = arith.subf %101, %104 : vector<16x16xf32>
    %106 = math.exp %105 : vector<16x16xf32>
    %cst_33 = arith.constant dense<0.000000e+00> : vector<16xf32>
    %107 = vector.multi_reduction <add>, %106, %cst_33 [1] : vector<16x16xf32> to vector<16xf32>
    %108 = vector.shape_cast %107 : vector<16xf32> to vector<16x1xf32>
    %109 = vector.broadcast %108 : vector<16x1xf32> to vector<16x16xf32>
    %110 = arith.divf %106, %109 : vector<16x16xf32>
    %111 = arith.truncf %110 : vector<16x16xf32> to vector<16x16xbf16>
    %cst_34 = arith.constant dense<0.000000e+00> : vector<16x32xf32>
    %112 = tpu.matmul %111, %98, %cst_34 {dimension_numbers = #tpu.dot_dimension_numbers<[1], [0], [0], [1], [0, 0, 1, 1], [], []>} : vector<16x16xbf16>, vector<16x32xbf16>, vector<16x32xf32> -> vector<16x32xf32>
    %113 = tpu.concatenate %52, %72, %92, %112 in 1 : vector<16x32xf32>, vector<16x32xf32>, vector<16x32xf32>, vector<16x32xf32> -> vector<16x128xf32>
    %114 = arith.truncf %113 : vector<16x128xf32> to vector<16x128xbf16>
    %c0_35 = arith.constant 0 : index
    %c0_36 = arith.constant 0 : index
    %115 = vector.load %arg6[%c0_35, %c0_36] : memref<128x128xf32, #tpu.memory_space<vmem>>, vector<128x128xf32>
    %116 = arith.truncf %115 : vector<128x128xf32> to vector<128x128xbf16>
    %cst_37 = arith.constant dense<0.000000e+00> : vector<16x128xf32>
    %117 = tpu.matmul %114, %116, %cst_37 {dimension_numbers = #tpu.dot_dimension_numbers<[1], [0], [0], [1], [0, 0, 1, 1], [], []>} : vector<16x128xbf16>, vector<128x128xbf16>, vector<16x128xf32> -> vector<16x128xf32>
    %c0_38 = arith.constant 0 : index
    %c0_39 = arith.constant 0 : index
    %118 = vector.load %arg7[%c0_38, %c0_39] : memref<1x128xf32, #tpu.memory_space<vmem>>, vector<1x128xf32>
    %119 = vector.broadcast %118 : vector<1x128xf32> to vector<16x128xf32>
    %120 = arith.addf %117, %119 : vector<16x128xf32>
    %121 = arith.addf %1, %120 : vector<16x128xf32>
    %c0_40 = arith.constant 0 : index
    %c0_41 = arith.constant 0 : index
    %122 = vector.load %arg8[%c0_40, %c0_41] : memref<1x128xf32, #tpu.memory_space<vmem>>, vector<1x128xf32>
    %c0_42 = arith.constant 0 : index
    %c0_43 = arith.constant 0 : index
    %123 = vector.load %arg9[%c0_42, %c0_43] : memref<1x128xf32, #tpu.memory_space<vmem>>, vector<1x128xf32>
    %cst_44 = arith.constant dense<0.000000e+00> : vector<16xf32>
    %124 = vector.multi_reduction <add>, %121, %cst_44 [1] : vector<16x128xf32> to vector<16xf32>
    %125 = vector.shape_cast %124 : vector<16xf32> to vector<16x1xf32>
    %cst_45 = arith.constant 1.280000e+02 : f32
    %126 = vector.broadcast %cst_45 : f32 to vector<16x1xf32>
    %127 = arith.divf %125, %126 : vector<16x1xf32>
    %128 = arith.mulf %121, %121 : vector<16x128xf32>
    %cst_46 = arith.constant dense<0.000000e+00> : vector<16xf32>
    %129 = vector.multi_reduction <add>, %128, %cst_46 [1] : vector<16x128xf32> to vector<16xf32>
    %130 = vector.shape_cast %129 : vector<16xf32> to vector<16x1xf32>
    %cst_47 = arith.constant 1.280000e+02 : f32
    %131 = vector.broadcast %cst_47 : f32 to vector<16x1xf32>
    %132 = arith.divf %130, %131 : vector<16x1xf32>
    %133 = arith.mulf %127, %127 : vector<16x1xf32>
    %134 = arith.subf %132, %133 : vector<16x1xf32>
    %135 = vector.broadcast %127 : vector<16x1xf32> to vector<16x128xf32>
    %136 = arith.subf %121, %135 : vector<16x128xf32>
    %cst_48 = arith.constant 9.99999997E-7 : f32
    %137 = vector.broadcast %cst_48 : f32 to vector<16x1xf32>
    %138 = arith.addf %134, %137 : vector<16x1xf32>
    %139 = math.rsqrt %138 : vector<16x1xf32>
    %140 = vector.broadcast %139 : vector<16x1xf32> to vector<16x128xf32>
    %141 = arith.mulf %136, %140 : vector<16x128xf32>
    %142 = vector.broadcast %122 : vector<1x128xf32> to vector<16x128xf32>
    %143 = arith.mulf %141, %142 : vector<16x128xf32>
    %144 = vector.broadcast %123 : vector<1x128xf32> to vector<16x128xf32>
    %145 = arith.addf %143, %144 : vector<16x128xf32>
    %146 = arith.truncf %145 : vector<16x128xf32> to vector<16x128xbf16>
    %c0_49 = arith.constant 0 : index
    %c0_50 = arith.constant 0 : index
    %147 = vector.load %arg10[%c0_49, %c0_50] : memref<128x512xf32, #tpu.memory_space<vmem>>, vector<128x512xf32>
    %148 = arith.truncf %147 : vector<128x512xf32> to vector<128x512xbf16>
    %cst_51 = arith.constant dense<0.000000e+00> : vector<16x512xf32>
    %149 = tpu.matmul %146, %148, %cst_51 {dimension_numbers = #tpu.dot_dimension_numbers<[1], [0], [0], [1], [0, 0, 1, 1], [], []>} : vector<16x128xbf16>, vector<128x512xbf16>, vector<16x512xf32> -> vector<16x512xf32>
    %c0_52 = arith.constant 0 : index
    %c0_53 = arith.constant 0 : index
    %150 = vector.load %arg11[%c0_52, %c0_53] : memref<1x512xf32, #tpu.memory_space<vmem>>, vector<1x512xf32>
    %151 = vector.broadcast %150 : vector<1x512xf32> to vector<16x512xf32>
    %152 = arith.addf %149, %151 : vector<16x512xf32>
    %cst_54 = arith.constant 5.000000e-01 : f32
    %153 = vector.broadcast %cst_54 : f32 to vector<16x512xf32>
    %154 = arith.mulf %153, %152 : vector<16x512xf32>
    %cst_55 = arith.constant 0.707106769 : f32
    %155 = vector.broadcast %cst_55 : f32 to vector<16x512xf32>
    %156 = arith.mulf %152, %155 : vector<16x512xf32>
    %157 = math.erf %156 : vector<16x512xf32>
    %cst_56 = arith.constant 1.000000e+00 : f32
    %158 = vector.broadcast %cst_56 : f32 to vector<16x512xf32>
    %159 = arith.addf %158, %157 : vector<16x512xf32>
    %160 = arith.mulf %154, %159 : vector<16x512xf32>
    %161 = arith.truncf %160 : vector<16x512xf32> to vector<16x512xbf16>
    %c0_57 = arith.constant 0 : index
    %c0_58 = arith.constant 0 : index
    %162 = vector.load %arg12[%c0_57, %c0_58] : memref<512x128xf32, #tpu.memory_space<vmem>>, vector<512x128xf32>
    %163 = arith.truncf %162 : vector<512x128xf32> to vector<512x128xbf16>
    %cst_59 = arith.constant dense<0.000000e+00> : vector<16x128xf32>
    %164 = tpu.matmul %161, %163, %cst_59 {dimension_numbers = #tpu.dot_dimension_numbers<[1], [0], [0], [1], [0, 0, 1, 1], [], []>} : vector<16x512xbf16>, vector<512x128xbf16>, vector<16x128xf32> -> vector<16x128xf32>
    %c0_60 = arith.constant 0 : index
    %c0_61 = arith.constant 0 : index
    %165 = vector.load %arg13[%c0_60, %c0_61] : memref<1x128xf32, #tpu.memory_space<vmem>>, vector<1x128xf32>
    %166 = vector.broadcast %165 : vector<1x128xf32> to vector<16x128xf32>
    %167 = arith.addf %164, %166 : vector<16x128xf32>
    %168 = arith.addf %121, %167 : vector<16x128xf32>
    %c0_62 = arith.constant 0 : index
    %c0_63 = arith.constant 0 : index
    %c0_64 = arith.constant 0 : index
    %169 = vector.load %arg14[%c0_62, %c0_63, %c0_64] : memref<1x16x128xf32, #tpu.memory_space<vmem>>, vector<1x16x128xf32>
    %170 = vector.shape_cast %169 : vector<1x16x128xf32> to vector<16x128xf32>
    %171 = vector.shape_cast %168 : vector<16x128xf32> to vector<1x16x128xf32>
    tpu.vector_store %arg14[%c0_62, %c0_63, %c0_64], %171 {strides = array<i32>} : memref<1x16x128xf32, #tpu.memory_space<vmem>>, vector<1x16x128xf32>,
    return
  }
  func.func @transform_0(%arg0: i32) -> (i32, i32, i32) {
    %c0_i32 = arith.constant 0 : i32
    %c0_i32_0 = arith.constant 0 : i32
    %c0_i32_1 = arith.constant 0 : i32
    return %arg0, %c0_i32, %c0_i32_0 : i32, i32, i32
  }
  func.func @transform_1(%arg0: i32) -> (i32, i32) {
    %c0_i32 = arith.constant 0 : i32
    %c0_i32_0 = arith.constant 0 : i32
    %c0_i32_1 = arith.constant 0 : i32
    return %c0_i32, %c0_i32_0 : i32, i32
  }
  func.func @transform_2(%arg0: i32) -> (i32, i32) {
    %c0_i32 = arith.constant 0 : i32
    %c0_i32_0 = arith.constant 0 : i32
    %c0_i32_1 = arith.constant 0 : i32
    return %c0_i32, %c0_i32_0 : i32, i32
  }
  func.func @transform_3(%arg0: i32) -> (i32, i32) {
    %c0_i32 = arith.constant 0 : i32
    %c0_i32_0 = arith.constant 0 : i32
    %c0_i32_1 = arith.constant 0 : i32
    return %c0_i32, %c0_i32_0 : i32, i32
  }
  func.func @transform_4(%arg0: i32) -> (i32, i32) {
    %c0_i32 = arith.constant 0 : i32
    %c0_i32_0 = arith.constant 0 : i32
    %c0_i32_1 = arith.constant 0 : i32
    return %c0_i32, %c0_i32_0 : i32, i32
  }
  func.func @transform_5(%arg0: i32) -> (i32, i32) {
    %c0_i32 = arith.constant 0 : i32
    %c0_i32_0 = arith.constant 0 : i32
    %c0_i32_1 = arith.constant 0 : i32
    return %c0_i32, %c0_i32_0 : i32, i32
  }
  func.func @transform_6(%arg0: i32) -> (i32, i32) {
    %c0_i32 = arith.constant 0 : i32
    %c0_i32_0 = arith.constant 0 : i32
    %c0_i32_1 = arith.constant 0 : i32
    return %c0_i32, %c0_i32_0 : i32, i32
  }
  func.func @transform_7(%arg0: i32) -> (i32, i32) {
    %c0_i32 = arith.constant 0 : i32
    %c0_i32_0 = arith.constant 0 : i32
    %c0_i32_1 = arith.constant 0 : i32
    return %c0_i32, %c0_i32_0 : i32, i32
  }
  func.func @transform_8(%arg0: i32) -> (i32, i32) {
    %c0_i32 = arith.constant 0 : i32
    %c0_i32_0 = arith.constant 0 : i32
    %c0_i32_1 = arith.constant 0 : i32
    return %c0_i32, %c0_i32_0 : i32, i32
  }
  func.func @transform_9(%arg0: i32) -> (i32, i32) {
    %c0_i32 = arith.constant 0 : i32
    %c0_i32_0 = arith.constant 0 : i32
    %c0_i32_1 = arith.constant 0 : i32
    return %c0_i32, %c0_i32_0 : i32, i32
  }
  func.func @transform_10(%arg0: i32) -> (i32, i32) {
    %c0_i32 = arith.constant 0 : i32
    %c0_i32_0 = arith.constant 0 : i32
    %c0_i32_1 = arith.constant 0 : i32
    return %c0_i32, %c0_i32_0 : i32, i32
  }
  func.func @transform_11(%arg0: i32) -> (i32, i32) {
    %c0_i32 = arith.constant 0 : i32
    %c0_i32_0 = arith.constant 0 : i32
    %c0_i32_1 = arith.constant 0 : i32
    return %c0_i32, %c0_i32_0 : i32, i32
  }
  func.func @transform_12(%arg0: i32) -> (i32, i32) {
    %c0_i32 = arith.constant 0 : i32
    %c0_i32_0 = arith.constant 0 : i32
    %c0_i32_1 = arith.constant 0 : i32
    return %c0_i32, %c0_i32_0 : i32, i32
  }
  func.func @transform_13(%arg0: i32) -> (i32, i32, i32) {
    %c0_i32 = arith.constant 0 : i32
    %c0_i32_0 = arith.constant 0 : i32
    %c0_i32_1 = arith.constant 0 : i32
    return %arg0, %c0_i32, %c0_i32_0 : i32, i32, i32
  }
}

</mosaic_0001>

<bundles_post_ra>
// kernel: tpu_custom_call.1
= control target key start
LH: loop header
LB: loop body
LE: loop exit
PB: predicated region body
PF: predicated region fallthrough
CT: control target
= control target key end

     0   :  { %s3264_s0 = inlined_call_operand.hbm [shape: f32[2,16,128], index: 0, kind: input, shape index: {}]   ;;  %s3265_s1 = inlined_call_operand.hbm [shape: f32[1,128], index: 1, kind: input, shape index: {}]   ;;  %s3266_s2 = inlined_call_operand.hbm [shape: f32[1,128], index: 2, kind: input, shape index: {}]   ;;  %s3267_s3 = inlined_call_operand.hbm [shape: f32[128,384], index: 3, kind: input, shape index: {}]   ;;  %s3268_s4 = inlined_call_operand.vmem [shape: f32[1,384], index: 4, kind: input, shape index: {}]   ;;  %s3269_s5 = inlined_call_operand.hbm [shape: f32[128,128], index: 5, kind: input, shape index: {}]   ;;  %s3270_s6 = inlined_call_operand.vmem [shape: f32[1,128], index: 6, kind: input, shape index: {}]   ;;  %s3271_s7 = inlined_call_operand.vmem [shape: f32[1,128], index: 7, kind: input, shape index: {}]   ;;  %s3272_s8 = inlined_call_operand.vmem [shape: f32[1,128], index: 8, kind: input, shape index: {}]   ;;  %s3273_s9 = inlined_call_operand.hbm [shape: f32[128,512], index: 9, kind: input, shape index: {}]   ;;  %s3274_s10 = inlined_call_operand.vmem [shape: f32[1,512], index: 10, kind: input, shape index: {}]   ;;  %s3275_s11 = inlined_call_operand.hbm [shape: f32[512,128], index: 11, kind: input, shape index: {}]   ;;  %s3276_s12 = inlined_call_operand.vmem [shape: f32[1,128], index: 12, kind: input, shape index: {}]   ;;  %s3277_s13 = inlined_call_operand.hbm [shape: f32[2,16,128], index: 13, kind: output, shape index: {}]  }
   0x1   :  { %3282 = sst [smem:[#allocation20_spill]] %s3265_s1 }
   0x2   :  { %3283 = sst [smem:[#allocation21_spill]] %s3267_s3 }
   0x3   :  { %3284 = sst [smem:[#allocation22_spill]] %s3271_s7 }
   0x4   :  { %3285 = sst [smem:[#allocation23_spill]] %s3272_s8 }
   0x5   :  { %3286 = sst [smem:[#allocation24_spill]] %s3274_s10 }
   0x6   :  { %3287 = sst [smem:[#allocation25_spill]] %s3276_s12 }
   0x7   :  { %3288 = sst [smem:[#allocation26_spill]] %s3277_s13 }
   0x8   :  { %18 = vsyncpa [#allocation3], 0 }
   0x9   :  { %20 = vsyncpa [#allocation3 + $0x1], 0 }
   0xa   :  { %21 = vsyncpa [#allocation6], 0 }
   0xb   :  { %22 = vsyncpa [#allocation9], 0 }
   0xc   :  { %23 = vsyncpa [#allocation12], 0 }
   0xd   :  { %24 = vsyncpa [#allocation4], 0 }
   0xe   :  { %26 = vsyncpa [#allocation4 + $0x1], 0  ;;  %s2760_s25 = smov 0   ;;  %s2762_s26 = smov 0  }
   0xf   :  { %s2764_s27 = smov 0   ;;  %s2766_s28 = smov 0  }
  0x10 LB: > { %s2668_s29 = smov [#allocation5]   ;;  %s2781_s14 = sadd.s32 4294967295, %s2666_s28   ;;  %s2666_s28 = sphi %s2766_s28, %s3318_s28   ;;  %s2662_s27 = sphi %s2764_s27, %s3317_s27   ;;  %s2658_s26 = sphi %s2762_s26, %s3316_s26   ;;  %s2654_s25 = sphi %s2760_s25, %s3315_s25  }
  0x11   : > { %s354_s30 = sshll.u32 %s2668_s29, 4  ;;  %p1991_p0 = scmp.ge.s32.totalorder %s2666_s28, 1  ;;  %s2786_s30 = int_to_ptr.vmem [resolvable:$true] %s354_s30 }
  0x12   : > { %p3279_p1 = scmp.eq.s32.totalorder %s2781_s14, 0  ;;  %p341_p2 = scmp.lt.s32.totalorder %s2666_s28, 3 }
  0x13   : > { %s2669_s16 = smov [#allocation8]   ;;  %s2670_s19 = smov [#allocation11]  }
  0x14   : > { %p2788_p3 = pnand %p1991_p0, %p341_p2  ;;  %s375_s17 = sshll.u32 %s2669_s16, 4  ;;  %s2795_s17 = int_to_ptr.vmem [resolvable:$true] %s375_s17 }
  0x15   : > { %s413_s20 = sshll.u32 %s2670_s19, 4  ;;  %s3291_s1 = sld [smem:[#allocation20_spill]]  ;;  %s2803_s20 = int_to_ptr.vmem [resolvable:$true] %s413_s20 }
  0x16   : > { %s3289_s15 = scalar_select %p2788_p3, 1, 0 }
  0x17   : > { %p2226_p5 = pneg %p2788_p3 }
  0x19   : > { %p2799_p6 = pnand %p2226_p5, %p3279_p1 }
  0x1b   : > { %s2390_s23 = scalar_lea.hbm %s3291_s1, 16  ;;  %p2813_p8 = pneg %p2799_p6 }
  0x1c   : > { %p2391_p7 = scmp.ne.s32.totalorder %s3291_s1, %s2390_s23  ;;  %p2397_p11 = scmp.lt.u32.totalorder %s2390_s23, %s3291_s1 }
  0x1e   : > { %p2393_p9 = pnand %p2813_p8, %p2391_p7 }
  0x20   : > { %p2394_p10 = pneg %p2393_p9 }
  0x22   : > { %p2399_p12 = pnand %p2397_p11, %p2394_p10 }
  0x24   : > { %2402 = shalt.err (!%p2399_p12)
}
  0x25   : > { %s2403_s21 = scalar_lea.vmem %s2786_s30, 16  ;;  %s2410_s22 = scalar_lea.vmem %s2786_s30, 32 }
  0x26   : > { %p2404_p13 = scmp.ne.s32.totalorder %s2786_s30, %s2403_s21  ;;  %p2411_p5 = scmp.lt.s32.totalorder %s2786_s30, %s2786_s30 }
  0x27   : > { %p2412_p7 = scmp.lt.s32.totalorder %s2410_s22, %s2403_s21 }
  0x28   : > { %p2406_p0 = pnand %p2404_p13, %p2813_p8 }
  0x29   : > { %p2413_p9 = por %p2412_p7, %p2411_p5 }
  0x2a   : > { %p2407_p2 = pneg %p2406_p0 }
  0x2c   : > { %p2414_p4 = pnand %p2413_p9, %p2407_p2 }
  0x2e   : > { %2417 = shalt.err (!%p2414_p4)
}
  0x2f   : > { %2229 = dma.hbm_to_vmem [thread:$0]  (!%p2799_p6), %s3291_s1, 16, %s2786_s30, [#allocation6]  }
  0x30   : > { %s3293_s3 = sld [smem:[#allocation21_spill]] }
  0x36   : > { %s2418_s19 = scalar_lea.hbm %s3293_s3, 6144 }
  0x37   : > { %p2419_p10 = scmp.ne.s32.totalorder %s3293_s3, %s2418_s19  ;;  %p2425_p4 = scmp.lt.u32.totalorder %s2418_s19, %s3293_s3 }
  0x39   : > { %p2421_p11 = pnand %p2419_p10, %p2813_p8 }
  0x3b   : > { %p2422_p12 = pneg %p2421_p11 }
  0x3d   : > { %p2427_p13 = pnand %p2425_p4, %p2422_p12 }
  0x3f   : > { %2430 = shalt.err (!%p2427_p13)
}
  0x40   : > { %s2431_s30 = scalar_lea.vmem %s2795_s17, 6144  ;;  %p2439_p7 = scmp.lt.s32.totalorder %s2795_s17, %s2795_s17 }
  0x41   : > { %p2432_p0 = scmp.ne.s32.totalorder %s2795_s17, %s2431_s30  ;;  %p2440_p9 = scmp.lt.s32.totalorder %s2431_s30, %s2431_s30 }
  0x43   : > { %p2434_p2 = pnand %p2432_p0, %p2813_p8  ;;  %p2441_p10 = por %p2440_p9, %p2439_p7 }
  0x45   : > { %p2435_p5 = pneg %p2434_p2 }
  0x47   : > { %p2442_p11 = pnand %p2441_p10, %p2435_p5 }
  0x49   : > { %2445 = shalt.err (!%p2442_p11)
}
  0x4a   : > { %s2671_s10 = smov 384   ;;  %s2672_s12 = smov 24  }
  0x4b   : > { %2235 = dma.hbm_to_vmem [thread:$0]  (!%p2799_p6), %s3293_s3, 6144, %s2795_s17, [#allocation9], %s2671_s10, %s2671_s10, %s2672_s12  }
  0x4c   : > { %s2446_s19 = scalar_lea.hbm %s3273_s9, 8192 }
  0x4d   : > { %p2447_p12 = scmp.ne.s32.totalorder %s3273_s9, %s2446_s19  ;;  %p2453_p0 = scmp.lt.u32.totalorder %s2446_s19, %s3273_s9 }
  0x4f   : > { %p2449_p4 = pnand %p2447_p12, %p2813_p8 }
  0x51   : > { %p2450_p13 = pneg %p2449_p4 }
  0x53   : > { %p2455_p2 = pnand %p2453_p0, %p2450_p13 }
  0x55   : > { %2458 = shalt.err (!%p2455_p2)
}
  0x56   : > { %s2459_s17 = scalar_lea.vmem %s2803_s20, 8192  ;;  %p2467_p10 = scmp.lt.s32.totalorder %s2803_s20, %s2803_s20 }
  0x57   : > { %p2460_p5 = scmp.ne.s32.totalorder %s2803_s20, %s2459_s17  ;;  %p2468_p11 = scmp.lt.s32.totalorder %s2459_s17, %s2459_s17 }
  0x59   : > { %p2462_p7 = pnand %p2460_p5, %p2813_p8  ;;  %p2469_p12 = por %p2468_p11, %p2467_p10 }
  0x5b   : > { %p2463_p9 = pneg %p2462_p7 }
  0x5d   : > { %p2470_p4 = pnand %p2469_p12, %p2463_p9 }
  0x5f   : > { %2473 = shalt.err (!%p2470_p4)
}
  0x60   : > { %s2673_s10 = smov 512   ;;  %s2674_s1 = smov 32  }
  0x61   : > { %2241 = dma.hbm_to_vmem [thread:$0]  (!%p2799_p6), %s3273_s9, 8192, %s2803_s20, [#allocation12], %s2673_s10, %s2673_s10, %s2674_s1  }
  0x62   : > { %s2675_s23 = smov [#allocation7]   ;;  %s2676_s29 = smov [#allocation10]  }
  0x63   : > { %s365_s24 = sshll.u32 %s2675_s23, 4  ;;  %s391_s19 = sshll.u32 %s2676_s29, 4  ;;  %s366_s24 = int_to_ptr.vmem [resolvable:$true] %s365_s24  ;;  %s392_s19 = int_to_ptr.vmem [resolvable:$true] %s391_s19 }
  0x64   : > { %s2474_s30 = scalar_lea.hbm %s3266_s2, 16 }
  0x65   : > { %p2475_p13 = scmp.ne.s32.totalorder %s3266_s2, %s2474_s30  ;;  %p2481_p5 = scmp.lt.u32.totalorder %s2474_s30, %s3266_s2 }
  0x67   : > { %p2477_p0 = pnand %p2475_p13, %p2813_p8 }
  0x69   : > { %p2478_p2 = pneg %p2477_p0 }
  0x6b   : > { %p2483_p7 = pnand %p2481_p5, %p2478_p2 }
  0x6d   : > { %2486 = shalt.err (!%p2483_p7)
}
  0x6e   : > { %s2487_s20 = scalar_lea.vmem %s366_s24, 16  ;;  %s2494_s10 = scalar_lea.vmem %s366_s24, 32 }
  0x6f   : > { %p2488_p9 = scmp.ne.s32.totalorder %s366_s24, %s2487_s20  ;;  %p2495_p12 = scmp.lt.s32.totalorder %s366_s24, %s366_s24 }
  0x70   : > { %p2496_p4 = scmp.lt.s32.totalorder %s2494_s10, %s2487_s20 }
  0x71   : > { %p2490_p10 = pnand %p2488_p9, %p2813_p8 }
  0x72   : > { %p2497_p1 = por %p2496_p4, %p2495_p12 }
  0x73   : > { %p2491_p11 = pneg %p2490_p10 }
  0x75   : > { %p2498_p3 = pnand %p2497_p1, %p2491_p11 }
  0x77   : > { %2501 = shalt.err (!%p2498_p3)
}
  0x78   : > { %2232 = dma.hbm_to_vmem [thread:$0]  (!%p2799_p6), %s3266_s2, 16, %s366_s24, [#allocation6]  }
  0x79   : > { %s2502_s12 = scalar_lea.hbm %s3269_s5, 2048 }
  0x7a   : > { %p2503_p13 = scmp.ne.s32.totalorder %s3269_s5, %s2502_s12  ;;  %p2509_p3 = scmp.lt.u32.totalorder %s2502_s12, %s3269_s5 }
  0x7c   : > { %p2505_p0 = pnand %p2503_p13, %p2813_p8 }
  0x7e   : > { %p2506_p1 = pneg %p2505_p0 }
  0x80   : > { %p2511_p2 = pnand %p2509_p3, %p2506_p1 }
  0x82   : > { %2514 = shalt.err (!%p2511_p2)
}
  0x83   : > { %s2515_s22 = scalar_lea.vmem %s392_s19, 2048  ;;  %p2523_p10 = scmp.lt.s32.totalorder %s392_s19, %s392_s19 }
  0x84   : > { %p2516_p5 = scmp.ne.s32.totalorder %s392_s19, %s2515_s22  ;;  %p2524_p11 = scmp.lt.s32.totalorder %s2515_s22, %s2515_s22 }
  0x86   : > { %p2518_p7 = pnand %p2516_p5, %p2813_p8  ;;  %p2525_p12 = por %p2524_p11, %p2523_p10 }
  0x88   : > { %p2519_p9 = pneg %p2518_p7 }
  0x8a   : > { %p2526_p4 = pnand %p2525_p12, %p2519_p9 }
  0x8c   : > { %2529 = shalt.err (!%p2526_p4)
}
  0x8d   : > { %s2677_s24 = smov 128   ;;  %s2678_s30 = smov 8  }
  0x8e   : > { %2238 = dma.hbm_to_vmem [thread:$0]  (!%p2799_p6), %s3269_s5, 2048, %s392_s19, [#allocation9], %s2677_s24, %s2677_s24, %s2678_s30  }
  0x8f   : > { %s2679_s10 = smov [#allocation13]   ;;  %s2530_s8 = scalar_lea.hbm %s3275_s11, 8192 }
  0x90   : > { %s429_s3 = sshll.u32 %s2679_s10, 4  ;;  %p2531_p13 = scmp.ne.s32.totalorder %s3275_s11, %s2530_s8  ;;  %s430_s3 = int_to_ptr.vmem [resolvable:$true] %s429_s3 }
  0x91   : > { %p2537_p3 = scmp.lt.u32.totalorder %s2530_s8, %s3275_s11 }
  0x92   : > { %p2533_p0 = pnand %p2531_p13, %p2813_p8 }
  0x94   : > { %p2534_p1 = pneg %p2533_p0 }
  0x96   : > { %p2539_p2 = pnand %p2537_p3, %p2534_p1 }
  0x98   : > { %2542 = shalt.err (!%p2539_p2)
}
  0x99   : > { %s2543_s19 = scalar_lea.vmem %s430_s3, 8192  ;;  %p2551_p10 = scmp.lt.s32.totalorder %s430_s3, %s430_s3 }
  0x9a   : > { %p2544_p5 = scmp.ne.s32.totalorder %s430_s3, %s2543_s19  ;;  %p2552_p11 = scmp.lt.s32.totalorder %s2543_s19, %s2543_s19 }
  0x9c   : > { %p2546_p7 = pnand %p2544_p5, %p2813_p8  ;;  %p2553_p12 = por %p2552_p11, %p2551_p10 }
  0x9e   : > { %p2547_p9 = pneg %p2546_p7 }
  0xa0   : > { %p2554_p4 = pnand %p2553_p12, %p2547_p9 }
  0xa2   : > { %2557 = shalt.err (!%p2554_p4)
}
  0xa3   : > { %2244 = dma.hbm_to_vmem [thread:$0]  (!%p2799_p6), %s3275_s11, 8192, %s430_s3, [#allocation12], %s2677_s24, %s2677_s24, %s2678_s30  }
  0xa4   : > { %s1990_s18 = sadd.s32 4294967294, %s2666_s28   ;;  %s2943_s16 = sadd.s32 1, %s2666_s28  }
  0xa5   : > { %s36_s17 = ssub.s32 %s2666_s28, %s2943_s16  ;;  %s39_s20 = sadd.s32 1, %s2662_s27 }
  0xa6   : > { %p37_p8 = scmp.eq.s32.totalorder %s36_s17, 0  ;;  %p46_p13 = scmp.ne.s32.totalorder %s2662_s27, %s2658_s26 }
  0xa7   : > { %p47_p0 = scmp.eq.s32.totalorder %s2666_s28, 0  ;;  %p52_p1 = scmp.ne.s32.totalorder %s2658_s26, %s2654_s25 }
  0xa8   : > { %s2954_s10 = scalar_select %p37_p8, %s2662_s27, %s39_s20  }
  0xa9   : > { %p2956_p3 = por %p47_p0, %p46_p13  ;;  %p3295_p2 = scmp.eq.s32.totalorder %s2781_s14, 0 }
  0xaa   : > { %p328_p5 = scmp.eq.s32.totalorder %s2781_s14, 1  ;;  %p334_p7 = scmp.eq.s32.totalorder %s1990_s18, 1 }
  0xab   : > { %p2962_p6 = por %p3295_p2, %p52_p1  ;;  %p2259_p9 = scmp.lt.s32.totalorder %s2666_s28, 2 }
  0xac   : > { %s446_s7 = sand.u32 1, %s2662_s27   ;;  %p2969_p10 = por %p328_p5, %p46_p13 }
  0xad   : > { %p2973_p11 = por %p334_p7, %p52_p1  ;;  %s1999_s13 = sshll.u32 %s446_s7, 4 }
  0xae   : > { %s3297_s8 = scalar_select %p2969_p10, 1, 0 }
  0xaf   : > { %s3298_s12 = scalar_select %p2973_p11, 1, 0 }
  0xb0   : > { %s2030_s23 = sshll.u32 %s2666_s28, 8  ;;  %s450_s22 = scalar_lea.vmem [#allocation2], %s1999_s13 }
  0xb1   : > { %s2981_s21 = scalar_lea.hbm %s3264_s0, %s2030_s23  ;;  %s457_s18 = sshll.u32 %s450_s22, 4  ;;  %s2983_s18 = int_to_ptr.vmem [resolvable:$true] %s457_s18 }
  0xb2   : > { %p2987_p12 = pnand %p2259_p9, %p2956_p3  ;;  %s2991_s20 = scalar_lea.sflag [#allocation3], %s446_s7 }
  0xb3   : > { %s2558_s29 = scalar_lea.hbm %s2981_s21, 256  ;;  %s2563_s1 = scalar_lea.hbm %s3264_s0, 512 }
  0xb4   : > { %p2559_p4 = scmp.ne.s32.totalorder %s2981_s21, %s2558_s29  ;;  %p2560_p8 = pneg %p2987_p12 }
  0xb5   : > { %p2564_p1 = scmp.lt.u32.totalorder %s2981_s21, %s3264_s0  ;;  %p2565_p3 = scmp.lt.u32.totalorder %s2563_s1, %s2558_s29 }
  0xb6   : > { %p2561_p13 = pnand %p2560_p8, %p2559_p4  ;;  %p2567_p5 = scmp.lt.u32.totalorder %s2558_s29, %s2981_s21 }
  0xb7   : > { %p2566_p2 = por %p2565_p3, %p2564_p1 }
  0xb8   : > { %p2562_p0 = pneg %p2561_p13 }
  0xb9   : > { %p2568_p7 = por %p2567_p5, %p2566_p2 }
  0xbb   : > { %p2569_p9 = pnand %p2568_p7, %p2562_p0 }
  0xbd   : > { %2572 = shalt.err (!%p2569_p9)
}
  0xbe   : > { %s2573_s7 = scalar_lea.vmem %s2983_s18, 256  ;;  %s2680_s13 = smov [#allocation2]  }
  0xbf   : > { %p2574_p4 = scmp.ne.s32.totalorder %s2983_s18, %s2573_s7  ;;  %s2578_s23 = sshll.u32 %s2680_s13, 4  ;;  %s2579_s23 = int_to_ptr.vmem [resolvable:$false] %s2578_s23 }
  0xc0   : > { %s2580_s19 = scalar_lea.vmem %s2579_s23, 512  ;;  %p2581_p10 = scmp.lt.s32.totalorder %s2983_s18, %s2579_s23 }
  0xc1   : > { %p2576_p13 = pnand %p2574_p4, %p2560_p8  ;;  %p2582_p1 = scmp.lt.s32.totalorder %s2580_s19, %s2573_s7 }
  0xc3   : > { %p2577_p11 = pneg %p2576_p13  ;;  %p2583_p3 = por %p2582_p1, %p2581_p10 }
  0xc5   : > { %p2584_p2 = pnand %p2583_p3, %p2577_p11 }
  0xc7   : > { %2587 = shalt.err (!%p2584_p2)
}
  0xc8   : > { %2248 = dma.hbm_to_vmem [thread:$0]  (!%p2987_p12), %s2981_s21, 256, %s2983_s18, %s2991_s20, %s2677_s24, %s2677_s24, %s2678_s30  }
  0xc9   : > { %p3300_p8 = scmp.ne.s32.totalorder %s3289_s15, 0 }
  0xca   : > { %s3025_s29 = sand.u32 (!%p3300_p8), 1, %s2658_s26  }
  0xcb   : > { %469 = sbr.rel (%p3300_p8) target bundleno = 2930 (0xb72), region = 72  ;;  %s2003_s1 = sshll.u32 (!%p3300_p8), %s3025_s29, 4 }
  0xcc   : > { %s472_s22 = scalar_lea.sflag (!%p3300_p8), [#allocation3], %s3025_s29  ;;  %s475_s17 = scalar_lea.vmem (!%p3300_p8), [#allocation2], %s2003_s1 }
  0xd2   : > { %2633 = dma.done.wait (%p2962_p6), %s472_s22, 256  }
  0xd3   : > { %2635 = vsyncadd (%p2962_p6), %s472_s22, 4294967040  ;;  %p3301_p10 = scmp.eq.s32.totalorder %s2781_s14, 0 }
  0xd5   : > { %2637 = dma.done.wait (%p3301_p10), [#allocation6], 32   ;;  %p3302_p11 = pmov %p3301_p10 }
  0xd6   : > { %p3303_p12 = pmov %p3301_p10 }
  0xd7   : > { %2639 = vsyncadd (%p3302_p11), [#allocation6], 4294967264 }
  0xd8   : > { %2641 = dma.done.wait (%p3303_p12), [#allocation9], 8192   ;;  %p3304_p0 = pmov %p3301_p10 }
  0xda   : > { %2643 = vsyncadd (%p3304_p0), [#allocation9], 4294959104  ;;  %p3305_p5 = pmov %p3304_p0 }
  0xdb   : > { %p3306_p7 = pmov %p3304_p0 }
  0xdc   : > { %2645 = dma.done.wait (%p3305_p5), [#allocation12], 16384  }
  0xdd   : > { %2647 = vsyncadd (%p3306_p7), [#allocation12], 4294950912  ;;  %v2681_v0 = vmov 0.0   ;;  %v3048_v1 = vld [vmem:[%s475_s17] sm:$0xff]  ;;  %v3050_v2 = vld [vmem:[%s475_s17 + $0x8] sm:$0xff]  ;;  %v2682_v48 = vmov 0  }
  0xde   : > { %2110 = vmatprep.subr.bf16.mxu1 %v2681_v0  ;;  %v592_v3 = vld [vmem:[#allocation8 + $0x8] sm:$0xff]  ;;  %547 = vadd.xlane.f32.xlu0 %v3048_v1  ;;  %v554_v4 = vmul.f32 %v3048_v1, %v3048_v1  ;;  %v595_v5 = vld [vmem:[#allocation8 + $0x20] sm:$0xff]  ;;  %v555_v7 = vmul.f32 %v3050_v2, %v3050_v2  ;;  %v594_v9 = vld [vmem:[#allocation8 + $0x18] sm:$0xff]  ;;  %vm2683_vm0 = vmmov 0   ;;  %vm767_vm1 = vcmask 261120   ;;  %s2684_s30 = smov 96  }
  0xdf   : > { %v640_v6 = vpack.c.bf16 %v595_v5, %v592_v3  ;;  %v591_v8 = vld [vmem:[#allocation8] sm:$0xff]  ;;  %v593_v10 = vld [vmem:[#allocation8 + $0x10] sm:$0xff]  ;;  %v596_v12 = vld [vmem:[#allocation8 + $0x28] sm:$0xff]  ;;  %712 = vmatprep.mubr.bf16.mxu0 %v2682_v48  ;;  %2126 = vmatprep.mubr.msk.bf16.mxu1 %vm2683_vm0, %v2681_v0  ;;  %vm817_vm2 = vcmask 130048   ;;  %s2685_s3 = smov 64   ;;  %s2686_s21 = smov 32  }
  0xe0   : > { %556 = vadd.xlane.f32.xlu1 %v554_v4  ;;  %v639_v11 = vpack.c.bf16 %v594_v9, %v591_v8  ;;  %v641_v13 = vpack.c.bf16 %v596_v12, %v593_v10  ;;  %v598_v14 = vld [vmem:[#allocation8 + $0x38] sm:$0xff]  ;;  %v601_v15 = vld [vmem:[#allocation8 + $0x50] sm:$0xff]  ;;  %v600_v18 = vld [vmem:[#allocation8 + $0x48] sm:$0xff]  ;;  %vm1283_vm3 = vcmask 523264   ;;  %vm1286_vm4 = vcmask 785408   ;;  %s3307_s23 = sld [smem:[#allocation22_spill]] }
  0xe1   : > { %680 = vmatprep.subr.bf16.mxu0 %v640_v6  ;;  %v643_v16 = vpack.c.bf16 %v601_v15, %v598_v14  ;;  %v597_v17 = vld [vmem:[#allocation8 + $0x30] sm:$0xff]  ;;  %v599_v19 = vld [vmem:[#allocation8 + $0x40] sm:$0xff]  ;;  %v602_v21 = vld [vmem:[#allocation8 + $0x58] sm:$0xff]  ;;  %s3308_s17 = sld [smem:[#allocation23_spill]]  ;;  %s3310_s18 = sld [smem:[#allocation25_spill]] }
  0xe2   : > { %549 = vadd.xlane.f32.xlu0 %v3050_v2  ;;  %681 = vmatpush1.bf16.msra.mxu0 %v639_v11  ;;  %v642_v20 = vpack.c.bf16 %v600_v18, %v597_v17  ;;  %v644_v22 = vpack.c.bf16 %v602_v21, %v599_v19  ;;  %v604_v23 = vld [vmem:[#allocation8 + $0x68] sm:$0xff]  ;;  %v607_v24 = vld [vmem:[#allocation8 + $0x80] sm:$0xff]  ;;  %v606_v27 = vld [vmem:[#allocation8 + $0x78] sm:$0xff]  ;;  %s541_s20 = scalar_lea.vmem [#allocation14], %s2003_s1  ;;  %s2031_s13 = sshll.u32 %s2781_s14, 8 }
  0xe3   : > { %2111 = vmatpush3.bf16.msra.mxu1 %v641_v13  ;;  %682 = vmatprep.subr.bf16.mxu0 %v643_v16  ;;  %v646_v25 = vpack.c.bf16 %v607_v24, %v604_v23  ;;  %v603_v26 = vld [vmem:[#allocation8 + $0x60] sm:$0xff]  ;;  %v605_v28 = vld [vmem:[#allocation8 + $0x70] sm:$0xff]  ;;  %v608_v30 = vld [vmem:[#allocation8 + $0x88] sm:$0xff]  ;;  %s1860_s7 = sshll.u32 %s541_s20, 4  ;;  %s3311_s22 = sld [smem:[#allocation26_spill]]  ;;  %s3214_s7 = int_to_ptr.vmem [resolvable:$true] %s1860_s7 }
  0xe4   : > { %558 = vadd.xlane.f32.xlu1 %v555_v7  ;;  %2112 = vmatprep.subr.bf16.mxu1 %v2681_v0  ;;  %v645_v29 = vpack.c.bf16 %v606_v27, %v603_v26  ;;  %v647_v31 = vpack.c.bf16 %v608_v30, %v605_v28  ;;  %v610_v32 = vld [vmem:[#allocation8 + $0x98] sm:$0xff]  ;;  %v613_v33 = vld [vmem:[#allocation8 + $0xb0] sm:$0xff]  ;;  %v612_v36 = vld [vmem:[#allocation8 + $0xa8] sm:$0xff]  ;;  %s1847_s1 = scalar_lea.sflag [#allocation4], %s3025_s29  ;;  %s2588_s15 = scalar_lea.vmem %s3214_s7, 256 }
  0xe5   : > { %v649_v34 = vpack.c.bf16 %v613_v33, %v610_v32  ;;  %v609_v35 = vld [vmem:[#allocation8 + $0x90] sm:$0xff]  ;;  %v611_v37 = vld [vmem:[#allocation8 + $0xa0] sm:$0xff]  ;;  %v614_v39 = vld [vmem:[#allocation8 + $0xb8] sm:$0xff]  ;;  %p2589_p6 = scmp.ne.s32.totalorder %s3214_s7, %s2588_s15  ;;  %p3312_p9 = scmp.ne.s32.totalorder %s3297_s8, 0 }
  0xe6   : > { %683 = vmatpush1.bf16.msra.mxu0 %v642_v20  ;;  %v648_v38 = vpack.c.bf16 %v612_v36, %v609_v35  ;;  %v650_v40 = vpack.c.bf16 %v614_v39, %v611_v37  ;;  %v616_v41 = vld [vmem:[#allocation8 + $0xc8] sm:$0xff]  ;;  %v619_v42 = vld [vmem:[#allocation8 + $0xe0] sm:$0xff]  ;;  %v618_v45 = vld [vmem:[#allocation8 + $0xd8] sm:$0xff]  ;;  %s2687_s14 = smov [#allocation14]  }
  0xe7   : > { %2113 = vmatpush3.bf16.msra.mxu1 %v644_v22  ;;  %684 = vmatprep.subr.bf16.mxu0 %v646_v25  ;;  %v615_v43 = vld [vmem:[#allocation8 + $0xc0] sm:$0xff]  ;;  %v652_v44 = vpack.c.bf16 %v619_v42, %v616_v41  ;;  %v617_v46 = vld [vmem:[#allocation8 + $0xd0] sm:$0xff]  ;;  %v620_v47 = vld [vmem:[#allocation8 + $0xe8] sm:$0xff]  ;;  %p2590_p4 = pnand %p2589_p6, %p3312_p9  ;;  %s2592_s24 = sshll.u32 %s2687_s14, 4  ;;  %s2593_s24 = int_to_ptr.vmem [resolvable:$false] %s2592_s24 }
  0xe8   : > { %2114 = vmatprep.subr.bf16.mxu1 %v2681_v0  ;;  %v651_v49 = vpack.c.bf16 %v618_v45, %v615_v43  ;;  %v653_v50 = vpack.c.bf16 %v620_v47, %v617_v46  ;;  %v622_v51 = vld [vmem:[#allocation8 + $0xf8] sm:$0xff]  ;;  %v625_v52 = vld [vmem:[#allocation8 + $0x110] sm:$0xff]  ;;  %v624_v55 = vld [vmem:[#allocation8 + $0x108] sm:$0xff]  ;;  %p2595_p1 = scmp.lt.s32.totalorder %s3214_s7, %s2593_s24 }
  0xe9   : > { %v621_v53 = vld [vmem:[#allocation8 + $0xf0] sm:$0xff]  ;;  %v655_v54 = vpack.c.bf16 %v625_v52, %v622_v51  ;;  %v623_v56 = vld [vmem:[#allocation8 + $0x100] sm:$0xff]  ;;  %v626_v57 = vld [vmem:[#allocation8 + $0x118] sm:$0xff]  ;;  %p2591_p13 = pneg %p2590_p4 }
  0xea   : > { %685 = vmatpush1.bf16.msra.mxu0 %v645_v29  ;;  %v654_v58 = vpack.c.bf16 %v624_v55, %v621_v53  ;;  %v628_v59 = vld [vmem:[#allocation8 + $0x128] sm:$0xff]  ;;  %v631_v60 = vld [vmem:[#allocation8 + $0x140] sm:$0xff]  ;;  %v656_v61 = vpack.c.bf16 %v626_v57, %v623_v56  ;;  %v630_v3 = vld [vmem:[#allocation8 + $0x138] sm:$0xff] }
  0xeb   : > { %2115 = vmatpush3.bf16.msra.mxu1 %v647_v31  ;;  %686 = vmatprep.subr.bf16.mxu0 %v649_v34  ;;  %v658_v62 = vpack.c.bf16 %v631_v60, %v628_v59  ;;  %v627_v63 = vld [vmem:[#allocation8 + $0x120] sm:$0xff]  ;;  %v629_v4 = vld [vmem:[#allocation8 + $0x130] sm:$0xff]  ;;  %v632_v5 = vld [vmem:[#allocation8 + $0x148] sm:$0xff] }
  0xec   : > { %2116 = vmatprep.subr.bf16.mxu1 %v2681_v0  ;;  %v634_v6 = vld [vmem:[#allocation8 + $0x158] sm:$0xff]  ;;  %v637_v7 = vld [vmem:[#allocation8 + $0x170] sm:$0xff]  ;;  %v657_v8 = vpack.c.bf16 %v630_v3, %v627_v63  ;;  %v659_v9 = vpack.c.bf16 %v632_v5, %v629_v4  ;;  %v636_v12 = vld [vmem:[#allocation8 + $0x168] sm:$0xff] }
  0xed   : > { %v661_v10 = vpack.c.bf16 %v637_v7, %v634_v6  ;;  %v633_v11 = vld [vmem:[#allocation8 + $0x150] sm:$0xff]  ;;  %v635_v13 = vld [vmem:[#allocation8 + $0x160] sm:$0xff]  ;;  %v638_v14 = vld [vmem:[#allocation8 + $0x178] sm:$0xff] }
  0xee   : > { %687 = vmatpush1.bf16.msra.mxu0 %v648_v38  ;;  %v660_v15 = vpack.c.bf16 %v636_v12, %v633_v11  ;;  %v662_v16 = vpack.c.bf16 %v638_v14, %v635_v13  ;;  %v2011_v34 = vld [vmem:[#allocation5] ss:$0 sm:$0xff]  ;;  %v2012_v39 = vld [vmem:[#allocation7] ss:$0 sm:$0xff] }
  0xef   : > { %2117 = vmatpush3.bf16.msra.mxu1 %v650_v40  ;;  %688 = vmatprep.subr.bf16.mxu0 %v652_v44  ;;  %v665_v44 = vlaneseq }
  0xf0   : > { %2118 = vmatprep.subr.bf16.mxu1 %v2681_v0 }
  0xf1   : > { %v3076_v45 = vshrl.u32 %v665_v44, 7 }
  0xf2   : > { %689 = vmatpush1.bf16.msra.mxu0 %v651_v49  ;;  %v663_v49 = vld [vmem:[%s3268_s4] sm:$0x7] }
  0xf3   : > { %2119 = vmatpush3.bf16.msra.mxu1 %v653_v50  ;;  %690 = vmatprep.subr.bf16.mxu0 %v655_v54  ;;  %v667_v46 = vsub.s32 0, %v3076_v45  ;;  %v675_v47 = vsub.s32 2, %v3076_v45  ;;  %v671_v50 = vsub.s32 1, %v3076_v45 }
  0xf4   : > { %2120 = vmatprep.subr.bf16.mxu1 %v2681_v0 }
  0xf5   : > { %v668_v51 = vrot.slane %v663_v49, %v667_v46  ;;  %v676_v52 = vrot.slane %v663_v49, %v675_v47  ;;  %v672_v55 = vrot.slane %v663_v49, %v671_v50 }
  0xf6   : > { %691 = vmatpush1.bf16.msra.mxu0 %v654_v58 }
  0xf7   : > { %2121 = vmatpush3.bf16.msra.mxu1 %v656_v61  ;;  %692 = vmatprep.subr.bf16.mxu0 %v658_v62 }
  0xf8   : > { %2122 = vmatprep.subr.bf16.mxu1 %v2681_v0 }
  0xfa   : > { %693 = vmatpush1.bf16.msra.mxu0 %v657_v8 }
  0xfb   : > { %2123 = vmatpush3.bf16.msra.mxu1 %v659_v9  ;;  %694 = vmatprep.subr.bf16.mxu0 %v661_v10 }
  0xfc   : > { %2124 = vmatprep.subr.bf16.mxu1 %v2681_v0 }
  0xfe   : > { %695 = vmatpush1.bf16.msra.mxu0 %v660_v15 }
  0xff   : > { %2125 = vmatpush3.bf16.msra.mxu1 %v662_v16  ;;  %2154 = vmatprep.subr.bf16.mxu0 %v2681_v0 }
 0x100   : > { %2130 = vmatprep.subr.bf16.mxu1 %v2681_v0 }
 0x16b   : > { %v548_v17 = vpop.xlane.xlu0 %547 }
 0x16c   : > { %v552_v18 = vmul.f32 0.0078125, %v548_v17 }
 0x16d   : > { %v557_v19 = vpop.xlane.xlu1 %556 }
 0x16e   : > { %v562_v20 = vmul.f32 %v552_v18, %v552_v18  ;;  %v560_v21 = vmul.f32 0.0078125, %v557_v19  ;;  %v566_v31 = vsub.f32 %v3048_v1, %v552_v18 }
 0x16f   : > { %v550_v22 = vpop.xlane.xlu0 %549 }
 0x170   : > { %v564_v23 = vsub.f32 %v560_v21, %v562_v20  ;;  %v553_v24 = vmul.f32 0.0078125, %v550_v22 }
 0x171   : > { %v559_v25 = vpop.xlane.xlu1 %558 }
 0x172   : > { %v568_v26 = vadd.f32 1e-06, %v564_v23  ;;  %v563_v27 = vmul.f32 %v553_v24, %v553_v24  ;;  %v561_v28 = vmul.f32 0.0078125, %v559_v25  ;;  %v567_v35 = vsub.f32 %v3050_v2, %v553_v24 }
 0x174   : > { %2334 = vrsqrt.f32 %v568_v26  ;;  %v565_v29 = vsub.f32 %v561_v28, %v563_v27 }
 0x176   : > { %v569_v30 = vadd.f32 1e-06, %v565_v29 }
 0x178   : > { %2336 = vrsqrt.f32 %v569_v30 }
 0x17e   : > { %v2335_v32 = vpop.eup %2334 }
 0x17f   : > { %v572_v33 = vmul.f32 %v2335_v32, %v566_v31 }
 0x181   : > { %v580_v38 = vmul.f32 %v2011_v34, %v572_v33 }
 0x182   : > { %v2337_v36 = vpop.eup %2336 }
 0x183   : > { %v573_v37 = vmul.f32 %v2337_v36, %v567_v35  ;;  %v588_v41 = vadd.f32 %v2012_v39, %v580_v38 }
 0x185   : > { %v581_v40 = vmul.f32 %v2011_v34, %v573_v37 }
 0x187   : > { %v589_v42 = vadd.f32 %v2012_v39, %v581_v40 }
 0x189   : > { %v590_v43 = vpack.c.bf16 %v589_v42, %v588_v41 }
 0x18b   : > { %713 = vmatmul.mubr.bf16.vlgmr.msra.gmra.mrb[0].mxu0 %v590_v43  ;;  %2127 = vmatmul.mubr.bf16.vlgmr.msra.gmra.mrb[0].mxu1 %v590_v43 }
 0x18c   : > { %2132 = vmatprep.mubr.msk.bf16.mxu1 %vm2683_vm0, %v2681_v0  ;;  %2156 = vmatprep.mubr.msk.bf16.mxu0 %vm2683_vm0, %v2681_v0 }
 0x25e   : > { %v714_v53 = vpop.f32.mrb[0].mxu0  ;;  %v757_v54 = vpop.f32.mrb[0].mxu1 }
 0x25f   : > { %v716_v56 = vpop.f32.mrb[1].mxu0  ;;  %v2128_v57 = vpop.f32.mrb[1].mxu1  ;;  %v715_v60 = vadd.f32 %v714_v53, %v668_v51  ;;  %v758_v61 = vadd.f32 %v757_v54, %v676_v52 }
 0x260   : > { %v718_v58 = vpop.f32.mrb[2].mxu0  ;;  %v760_v59 = vpop.f32.mrb[2].mxu1  ;;  %v717_v5 = vadd.f32 %v716_v56, %v672_v55 }
 0x261   : > { %v719_v62 = vadd.f32 %v718_v58, %v668_v51  ;;  %v761_v63 = vadd.f32 %v760_v59, %v676_v52  ;;  %v720_v3 = vpop.f32.mrb[3].mxu0  ;;  %v2129_v4 = vpop.f32.mrb[3].mxu1 }
 0x262   : > { %v721_v6 = vadd.f32 %v720_v3, %v672_v55 }
 0x263   : > { %v764_v7 = vpack.c.bf16 %v719_v62, %v715_v60  ;;  %v3090_v8 = vpack.c.bf16 %v761_v63, %v758_v61 }
 0x264   : > { %v765_v9 = vpack.c.bf16 %v721_v6, %v717_v5 }
 0x266   : > { %v772_v10 = vsel %vm767_vm1, %v765_v9, 0 }
 0x267   : > { %2131 = vmatpush3.bf16.xpose.msra.mxu1 %v772_v10 }
 0x268   : > { %2136 = vmatprep.subr.bf16.mxu1 %v2681_v0 }
 0x26e   : > { %2133 = vmatmul.mubr.msk.bf16.vlgmr.msra.gmra.mrb[4].mxu1 %vm767_vm1, %v764_v7 }
 0x26f   : > { %2137 = vmatpush3.bf16.msra.mxu1 %v3090_v8  ;;  %2138 = vmatprep.mubr.msk.bf16.mxu1 %vm2683_vm0, %v2681_v0 }
 0x270   : > { %2142 = vmatprep.subr.bf16.mxu1 %v2681_v0 }
 0x341   : > { %v808_v11 = vpop.f32.mrb[4].mxu1 }
 0x342   : > { %v815_v12 = vmul.f32 0.17677669, %v808_v11  ;;  %v2134_v13 = vpop.f32.mrb[5].mxu1 }
 0x343   : > { %v811_v14 = vpop.f32.mrb[6].mxu1 }
 0x344   : > { %v816_v15 = vmul.f32 0.17677669, %v811_v14  ;;  %v2135_v16 = vpop.f32.mrb[7].mxu1  ;;  %v818_v17 = vsel %vm817_vm2, %v815_v12, -inf }
 0x345   : > { %819 = vmax.xlane.f32.xlu0 %v818_v17 }
 0x346   : > { %v821_v18 = vsel %vm817_vm2, %v816_v15, -inf }
 0x347   : > { %822 = vmax.xlane.f32.xlu1 %v821_v18 }
 0x3d2   : > { %v820_v19 = vpop.xlane.xlu0 %819 }
 0x3d3   : > { %v824_v20 = vsub.f32 %v815_v12, %v820_v19 }
 0x3d4   : > { %v823_v21 = vpop.xlane.xlu1 %822 }
 0x3d5   : > { %v826_v22 = vmul.f32 1.442695, %v824_v20  ;;  %v825_v23 = vsub.f32 %v816_v15, %v823_v21 }
 0x3d7   : > { %2338 = vpow2.f32 %v826_v22  ;;  %v828_v24 = vmul.f32 1.442695, %v825_v23 }
 0x3d9   : > { %2340 = vpow2.f32 %v828_v24 }
 0x3e1   : > { %v2339_v25 = vpop.eup %2338 }
 0x3e2   : > { %v830_v26 = vsel %vm817_vm2, %v2339_v25, 0.0 }
 0x3e3   : > { %v2341_v27 = vpop.eup %2340  ;;  %831 = vadd.xlane.f32.xlu0 %v830_v26 }
 0x3e4   : > { %v833_v28 = vsel %vm817_vm2, %v2341_v27, 0.0 }
 0x3e5   : > { %834 = vadd.xlane.f32.xlu1 %v833_v28 }
 0x3f6   : > { %886 = vrot.lane.b32.xlu1 %v764_v7, %s2684_s30 }
 0x3f9   : > { %889 = vrot.lane.b32.xlu0 %v765_v9, %s2684_s30 }
 0x3fa   : > { %1013 = vrot.lane.b32.xlu1 %v765_v9, %s2685_s3 }
 0x3fd   : > { %1136 = vrot.lane.b32.xlu0 %v765_v9, %s2686_s21 }
 0x3fe   : > { %1011 = vrot.lane.b32.xlu1 %v764_v7, %s2685_s3 }
 0x402   : > { %1134 = vrot.lane.b32.xlu1 %v764_v7, %s2686_s21 }
 0x470   : > { %v832_v29 = vpop.xlane.xlu0 %831 }
 0x471   : > { %2342 = vrcp.f32 %v832_v29 }
 0x472   : > { %v835_v30 = vpop.xlane.xlu1 %834 }
 0x473   : > { %2344 = vrcp.f32 %v835_v30 }
 0x474   : > { %v890_v32 = vpop.permute.xlu0 %889 }
 0x475   : > { %v895_v41 = vsel %vm767_vm1, %v890_v32, 0 }
 0x476   : > { %v887_v31 = vpop.permute.xlu1 %886 }
 0x478   : > { %v1137_v39 = vpop.permute.xlu0 %1136 }
 0x479   : > { %v1142_v43 = vsel %vm767_vm1, %v1137_v39, 0 }
 0x47a   : > { %v1014_v33 = vpop.permute.xlu1 %1013 }
 0x47b   : > { %v2343_v34 = vpop.eup %2342  ;;  %v1019_v35 = vsel %vm767_vm1, %v1014_v33, 0 }
 0x47c   : > { %2155 = vmatpush3.bf16.xpose.msra.mxu0 %v1019_v35  ;;  %v837_v37 = vmul.f32 %v2343_v34, %v2339_v25 }
 0x47d   : > { %v2345_v36 = vpop.eup %2344  ;;  %2166 = vmatprep.subr.bf16.mxu0 %v2681_v0 }
 0x47e   : > { %v839_v38 = vmul.f32 %v2345_v36, %v2341_v27  ;;  %v1012_v42 = vpop.permute.xlu1 %1011 }
 0x480   : > { %v840_v40 = vpack.c.bf16 %v839_v38, %v837_v37 }
 0x482   : > { %2139 = vmatmul.mubr.msk.bf16.vlgmr.msra.gmra.mrb[8].mxu1 %vm817_vm2, %v840_v40  ;;  %v1135_v44 = vpop.permute.xlu1 %1134 }
 0x483   : > { %2143 = vmatpush3.bf16.xpose.msra.mxu1 %v895_v41  ;;  %2157 = vmatmul.mubr.msk.bf16.vlgmr.msra.gmra.mrb[4].mxu0 %vm767_vm1, %v1012_v42 }
 0x484   : > { %2167 = vmatpush3.bf16.xpose.msra.mxu0 %v1142_v43  ;;  %2144 = vmatprep.mubr.msk.bf16.mxu1 %vm2683_vm0, %v2681_v0 }
 0x485   : > { %2168 = vmatprep.mubr.msk.bf16.mxu0 %vm2683_vm0, %v2681_v0  ;;  %2148 = vmatprep.subr.bf16.mxu1 %v2681_v0 }
 0x486   : > { %2178 = vmatprep.subr.bf16.mxu0 %v2681_v0 }
 0x48a   : > { %2145 = vmatmul.mubr.msk.bf16.vlgmr.msra.gmra.mrb[12].mxu1 %vm767_vm1, %v887_v31 }
 0x48b   : > { %2169 = vmatmul.mubr.msk.bf16.vlgmr.msra.gmra.mrb[8].mxu0 %vm767_vm1, %v1135_v44  ;;  %2150 = vmatprep.mubr.msk.bf16.mxu1 %vm2683_vm0, %v2681_v0 }
 0x48c   : > { %2194 = vmatprep.mubr.msk.bf16.mxu0 %vm2683_vm0, %v2681_v0 }
 0x555   : > { %v3127_v49 = vpop.f32.mrb[8].mxu1 }
 0x556   : > { %v2140_v51 = vpop.f32.mrb[9].mxu1  ;;  %v1055_v52 = vpop.f32.mrb[4].mxu0 }
 0x557   : > { %v3129_v53 = vpop.f32.mrb[10].mxu1  ;;  %v2158_v54 = vpop.f32.mrb[5].mxu0  ;;  %v1062_v62 = vmul.f32 0.17677669, %v1055_v52 }
 0x558   : > { %v2141_v55 = vpop.f32.mrb[11].mxu1  ;;  %v1058_v56 = vpop.f32.mrb[6].mxu0 }
 0x559   : > { %v2159_v57 = vpop.f32.mrb[7].mxu0  ;;  %v1063_v12 = vmul.f32 0.17677669, %v1058_v56  ;;  %v1064_v13 = vsel %vm817_vm2, %v1062_v62, -inf }
 0x55b   : > { %v1067_v16 = vsel %vm817_vm2, %v1063_v12, -inf }
 0x55d   : > { %v931_v58 = vpop.f32.mrb[12].mxu1 }
 0x55e   : > { %v938_v59 = vmul.f32 0.17677669, %v931_v58  ;;  %v2146_v60 = vpop.f32.mrb[13].mxu1  ;;  %v1178_v61 = vpop.f32.mrb[8].mxu0 }
 0x55f   : > { %v934_v63 = vpop.f32.mrb[14].mxu1  ;;  %v2170_v3 = vpop.f32.mrb[9].mxu0  ;;  %v1185_v15 = vmul.f32 0.17677669, %v1178_v61 }
 0x560   : > { %v939_v4 = vmul.f32 0.17677669, %v934_v63  ;;  %v2147_v5 = vpop.f32.mrb[15].mxu1  ;;  %v1181_v6 = vpop.f32.mrb[10].mxu0  ;;  %v940_v7 = vsel %vm817_vm2, %v938_v59, -inf }
 0x561   : > { %v2171_v9 = vpop.f32.mrb[11].mxu0  ;;  %941 = vmax.xlane.f32.xlu0 %v940_v7  ;;  %v1186_v10 = vmul.f32 0.17677669, %v1181_v6  ;;  %v1187_v17 = vsel %vm817_vm2, %v1185_v15, -inf }
 0x562   : > { %v943_v11 = vsel %vm817_vm2, %v939_v4, -inf }
 0x563   : > { %944 = vmax.xlane.f32.xlu1 %v943_v11  ;;  %v1190_v14 = vsel %vm817_vm2, %v1186_v10, -inf }
 0x565   : > { %1065 = vmax.xlane.f32.xlu0 %v1064_v13 }
 0x567   : > { %1191 = vmax.xlane.f32.xlu1 %v1190_v14 }
 0x569   : > { %1068 = vmax.xlane.f32.xlu0 %v1067_v16 }
 0x56d   : > { %1188 = vmax.xlane.f32.xlu0 %v1187_v17 }
 0x5ee   : > { %v942_v18 = vpop.xlane.xlu0 %941 }
 0x5ef   : > { %v946_v27 = vsub.f32 %v938_v59, %v942_v18  ;;  %v1290_v18 = vld [vmem:[#allocation10] sm:$0xff] }
 0x5f0   : > { %v945_v19 = vpop.xlane.xlu1 %944 }
 0x5f1   : > { %v947_v28 = vsub.f32 %v939_v4, %v945_v19  ;;  %v948_v33 = vmul.f32 1.442695, %v946_v27  ;;  %v1291_v19 = vld [vmem:[#allocation10 + $0x8] sm:$0xff]  ;;  %v1296_v27 = vld [vmem:[#allocation10 + $0x30] sm:$0xff] }
 0x5f2   : > { %v1066_v20 = vpop.xlane.xlu0 %1065 }
 0x5f3   : > { %v1070_v21 = vsub.f32 %v1062_v62, %v1066_v20  ;;  %v950_v34 = vmul.f32 1.442695, %v947_v28  ;;  %v1292_v20 = vld [vmem:[#allocation10 + $0x10] sm:$0xff]  ;;  %v1297_v28 = vld [vmem:[#allocation10 + $0x38] sm:$0xff] }
 0x5f4   : > { %v1192_v22 = vpop.xlane.xlu1 %1191 }
 0x5f5   : > { %v1072_v23 = vmul.f32 1.442695, %v1070_v21  ;;  %v1194_v24 = vsub.f32 %v1186_v10, %v1192_v22  ;;  %v1306_v21 = vpack.c.bf16 %v1291_v19, %v1290_v18  ;;  %v1293_v22 = vld [vmem:[#allocation10 + $0x18] sm:$0xff] }
 0x5f6   : > { %v1069_v25 = vpop.xlane.xlu0 %1068  ;;  %v2021_v18 = vld [vmem:[%s3270_s6] ss:$0 sm:$0xff] }
 0x5f7   : > { %2346 = vpow2.f32 %v1072_v23  ;;  %v1071_v26 = vsub.f32 %v1063_v12, %v1069_v25  ;;  %v1197_v29 = vmul.f32 1.442695, %v1194_v24  ;;  %2179 = vmatpush3.bf16.msra.mxu0 %v1306_v21  ;;  %v1307_v23 = vpack.c.bf16 %v1293_v22, %v1292_v20  ;;  %v1294_v24 = vld [vmem:[#allocation10 + $0x20] sm:$0xff]  ;;  %v1295_v25 = vld [vmem:[#allocation10 + $0x28] sm:$0xff] }
 0x5f8   : > { %2180 = vmatprep.subr.bf16.mxu0 %v2681_v0 }
 0x5f9   : > { %v1074_v30 = vmul.f32 1.442695, %v1071_v26  ;;  %v1308_v26 = vpack.c.bf16 %v1295_v25, %v1294_v24 }
 0x5fa   : > { %v1189_v31 = vpop.xlane.xlu0 %1188 }
 0x5fb   : > { %2348 = vpow2.f32 %v1074_v30  ;;  %v1193_v32 = vsub.f32 %v1185_v15, %v1189_v31  ;;  %2181 = vmatpush3.bf16.msra.mxu0 %v1307_v23  ;;  %v1298_v30 = vld [vmem:[#allocation10 + $0x40] sm:$0xff]  ;;  %v1299_v31 = vld [vmem:[#allocation10 + $0x48] sm:$0xff] }
 0x5fc   : > { %2350 = vpow2.f32 %v1197_v29  ;;  %2182 = vmatprep.subr.bf16.mxu0 %v2681_v0  ;;  %v1309_v29 = vpack.c.bf16 %v1297_v28, %v1296_v27  ;;  %v1412_v27 = vld [vmem:[#allocation11 + $0x18] sm:$0xff] }
 0x5fd   : > { %v1195_v35 = vmul.f32 1.442695, %v1193_v32  ;;  %v1310_v32 = vpack.c.bf16 %v1299_v31, %v1298_v30  ;;  %v1409_v30 = vld [vmem:[#allocation11] sm:$0xff] }
 0x5ff   : > { %2352 = vpow2.f32 %v1195_v35  ;;  %2183 = vmatpush3.bf16.msra.mxu0 %v1308_v26  ;;  %v1301_v35 = vld [vmem:[#allocation10 + $0x58] sm:$0xff]  ;;  %v1410_v26 = vld [vmem:[#allocation11 + $0x8] sm:$0xff] }
 0x600   : > { %2354 = vpow2.f32 %v948_v33  ;;  %2184 = vmatprep.subr.bf16.mxu0 %v2681_v0 }
 0x601   : > { %v2347_v36 = vpop.eup %2346  ;;  %2356 = vpow2.f32 %v950_v34  ;;  %v1300_v34 = vld [vmem:[#allocation10 + $0x50] sm:$0xff] }
 0x602   : > { %v1076_v37 = vsel %vm817_vm2, %v2347_v36, 0.0 }
 0x603   : > { %1077 = vadd.xlane.f32.xlu0 %v1076_v37  ;;  %2185 = vmatpush3.bf16.msra.mxu0 %v1309_v29  ;;  %v1311_v37 = vpack.c.bf16 %v1301_v35, %v1300_v34  ;;  %v1416_v29 = vld [vmem:[#allocation11 + $0x38] sm:$0xff]  ;;  %v1415_v34 = vld [vmem:[#allocation11 + $0x30] sm:$0xff] }
 0x604   : > { %2186 = vmatprep.subr.bf16.mxu0 %v2681_v0  ;;  %v1476_v31 = vpack.c.bf16 %v1416_v29, %v1412_v27  ;;  %v1452_v29 = vld [vmem:[#allocation11 + $0x158] sm:$0xff] }
 0x605   : > { %v2349_v38 = vpop.eup %2348 }
 0x606   : > { %v1079_v39 = vsel %vm817_vm2, %v2349_v38, 0.0  ;;  %v2351_v40 = vpop.eup %2350 }
 0x607   : > { %1080 = vadd.xlane.f32.xlu1 %v1079_v39  ;;  %v1202_v44 = vsel %vm817_vm2, %v2351_v40, 0.0  ;;  %2187 = vmatpush3.bf16.msra.mxu0 %v1310_v32  ;;  %v1302_v39 = vld [vmem:[#allocation10 + $0x60] sm:$0xff] }
 0x608   : > { %2188 = vmatprep.subr.bf16.mxu0 %v2681_v0 }
 0x609   : > { %v2353_v41 = vpop.eup %2352 }
 0x60a   : > { %v2355_v42 = vpop.eup %2354  ;;  %v1199_v43 = vsel %vm817_vm2, %v2353_v41, 0.0 }
 0x60b   : > { %v2357_v51 = vpop.eup %2356  ;;  %1200 = vadd.xlane.f32.xlu0 %v1199_v43  ;;  %1203 = vadd.xlane.f32.xlu1 %v1202_v44  ;;  %v952_v52 = vsel %vm817_vm2, %v2355_v42, 0.0 }
 0x60c   : > { %v955_v54 = vsel %vm817_vm2, %v2357_v51, 0.0  ;;  %2189 = vmatpush3.bf16.msra.mxu0 %v1311_v37  ;;  %v1422_v37 = vld [vmem:[#allocation11 + $0x68] sm:$0xff] }
 0x60d   : > { %2190 = vmatprep.subr.bf16.mxu0 %v2681_v0 }
 0x60f   : > { %953 = vadd.xlane.f32.xlu0 %v952_v52  ;;  %956 = vadd.xlane.f32.xlu1 %v955_v54  ;;  %v1305_v52 = vld [vmem:[#allocation10 + $0x78] sm:$0xff] }
 0x620   : > { %1087 = vrot.lane.b32.xlu1 %v3090_v8, %s2685_s3 }
 0x624   : > { %1210 = vrot.lane.b32.xlu1 %v3090_v8, %s2686_s21 }
 0x625   : > { %964 = vrot.lane.b32.xlu0 %v3090_v8, %s2684_s30 }
 0x690   : > { %v1078_v55 = vpop.xlane.xlu0 %1077 }
 0x694   : > { %v1081_v56 = vpop.xlane.xlu1 %1080 }
 0x698   : > { %v1201_v57 = vpop.xlane.xlu0 %1200  ;;  %v1204_v58 = vpop.xlane.xlu1 %1203 }
 0x69c   : > { %v954_v59 = vpop.xlane.xlu0 %953  ;;  %v957_v60 = vpop.xlane.xlu1 %956 }
 0x69d   : > { %2358 = vrcp.f32 %v954_v59 }
 0x69e   : > { %2360 = vrcp.f32 %v957_v60 }
 0x69f   : > { %2362 = vrcp.f32 %v1081_v56 }
 0x6a0   : > { %v965_v61 = vpop.permute.xlu0 %964  ;;  %2364 = vrcp.f32 %v1078_v55  ;;  %v1088_v6 = vpop.permute.xlu1 %1087 }
 0x6a1   : > { %2149 = vmatpush3.bf16.msra.mxu1 %v965_v61  ;;  %2366 = vrcp.f32 %v1201_v57 }
 0x6a2   : > { %2160 = vmatprep.subr.bf16.mxu1 %v2681_v0  ;;  %2368 = vrcp.f32 %v1204_v58 }
 0x6a4   : > { %v1211_v14 = vpop.permute.xlu1 %1210 }
 0x6a7   : > { %v2359_v62 = vpop.eup %2358 }
 0x6a8   : > { %v2361_v63 = vpop.eup %2360  ;;  %v959_v3 = vmul.f32 %v2359_v62, %v2355_v42 }
 0x6a9   : > { %v961_v4 = vmul.f32 %v2361_v63, %v2357_v51  ;;  %v2363_v5 = vpop.eup %2362  ;;  %v1304_v51 = vld [vmem:[#allocation10 + $0x70] sm:$0xff] }
 0x6aa   : > { %v2365_v7 = vpop.eup %2364  ;;  %v1085_v9 = vmul.f32 %v2363_v5, %v2349_v38  ;;  %v1313_v55 = vpack.c.bf16 %v1305_v52, %v1304_v51  ;;  %v1419_v51 = vld [vmem:[#allocation11 + $0x50] sm:$0xff] }
 0x6ab   : > { %v962_v8 = vpack.c.bf16 %v961_v4, %v959_v3  ;;  %v1083_v10 = vmul.f32 %v2365_v7, %v2347_v36  ;;  %v2367_v11 = vpop.eup %2366  ;;  %v1423_v52 = vld [vmem:[#allocation11 + $0x70] sm:$0xff] }
 0x6ac   : > { %v2369_v13 = vpop.eup %2368  ;;  %v1206_v15 = vmul.f32 %v2367_v11, %v2353_v41 }
 0x6ad   : > { %2151 = vmatmul.mubr.msk.bf16.vlgmr.msra.gmra.mrb[16].mxu1 %vm817_vm2, %v962_v8  ;;  %v1086_v12 = vpack.c.bf16 %v1085_v9, %v1083_v10  ;;  %v1208_v16 = vmul.f32 %v2369_v13, %v2351_v40  ;;  %v1303_v40 = vld [vmem:[#allocation10 + $0x68] sm:$0xff] }
 0x6ae   : > { %2161 = vmatpush3.bf16.msra.mxu1 %v1088_v6  ;;  %2162 = vmatprep.mubr.msk.bf16.mxu1 %vm2683_vm0, %v2681_v0  ;;  %v1312_v43 = vpack.c.bf16 %v1303_v40, %v1302_v39  ;;  %v1424_v40 = vld [vmem:[#allocation11 + $0x78] sm:$0xff] }
 0x6af   : > { %2172 = vmatprep.subr.bf16.mxu1 %v2681_v0  ;;  %v1209_v17 = vpack.c.bf16 %v1208_v16, %v1206_v15 }
 0x6b0   : > { %2191 = vmatpush3.bf16.msra.mxu0 %v1312_v43 }
 0x6b1   : > { %2192 = vmatprep.subr.bf16.mxu0 %v2681_v0 }
 0x6b4   : > { %2193 = vmatpush3.bf16.msra.mxu0 %v1313_v55  ;;  %v1426_v55 = vld [vmem:[#allocation11 + $0x88] sm:$0xff] }
 0x6b5   : > { %2163 = vmatmul.mubr.msk.bf16.vlgmr.msra.gmra.mrb[20].mxu1 %vm817_vm2, %v1086_v12  ;;  %1570 = vmatprep.subr.bf16.mxu0 %v1476_v31 }
 0x6b6   : > { %2173 = vmatpush3.bf16.msra.mxu1 %v1211_v14  ;;  %2174 = vmatprep.mubr.msk.bf16.mxu1 %vm2683_vm0, %v2681_v0 }
 0x6bd   : > { %2175 = vmatmul.mubr.msk.bf16.vlgmr.msra.gmra.mrb[24].mxu1 %vm817_vm2, %v1209_v17 }
 0x6be   : > { %1559 = vmatprep.mubr.bf16.mxu1 %v2682_v48 }
 0x780   : > { %v1004_v33 = vpop.f32.mrb[16].mxu1 }
 0x781   : > { %v2152_v36 = vpop.f32.mrb[17].mxu1 }
 0x782   : > { %v1007_v38 = vpop.f32.mrb[18].mxu1  ;;  %v1418_v36 = vld [vmem:[#allocation11 + $0x48] sm:$0xff] }
 0x783   : > { %v2319_v41 = vpack.i.bf16 %v1007_v38, %v1004_v33  ;;  %v2153_v42 = vpop.f32.mrb[19].mxu1  ;;  %v1411_v33 = vld [vmem:[#allocation11 + $0x10] sm:$0xff]  ;;  %v1420_v38 = vld [vmem:[#allocation11 + $0x58] sm:$0xff]  ;;  %v1478_v39 = vpack.c.bf16 %v1422_v37, %v1418_v36  ;;  %v1458_v37 = vld [vmem:[#allocation11 + $0x188] sm:$0xff] }
 0x784   : > { %v1475_v35 = vpack.c.bf16 %v1415_v34, %v1411_v33  ;;  %v1421_v42 = vld [vmem:[#allocation11 + $0x60] sm:$0xff]  ;;  %v1480_v43 = vpack.c.bf16 %v1424_v40, %v1420_v38  ;;  %v1451_v34 = vld [vmem:[#allocation11 + $0x150] sm:$0xff]  ;;  %v1462_v38 = vld [vmem:[#allocation11 + $0x1a8] sm:$0xff] }
 0x785   : > { %2320 = vrot.lane.b32.xlu1 %v2319_v41, %s2686_s21  ;;  %v1417_v41 = vld [vmem:[#allocation11 + $0x40] sm:$0xff]  ;;  %v1455_v36 = vld [vmem:[#allocation11 + $0x170] sm:$0xff]  ;;  %v1498_v40 = vpack.c.bf16 %v1462_v38, %v1458_v37  ;;  %v1690_v37 = vld [vmem:[#allocation13 + $0x108] sm:$0xff] }
 0x786   : > { %v1453_v33 = vld [vmem:[#allocation11 + $0x160] sm:$0xff]  ;;  %v1675_v38 = vld [vmem:[#allocation13 + $0x90] sm:$0xff] }
 0x788   : > { %v1127_v44 = vpop.f32.mrb[20].mxu1 }
 0x789   : > { %v2164_v54 = vpop.f32.mrb[21].mxu1 }
 0x78a   : > { %v1130_v56 = vpop.f32.mrb[22].mxu1  ;;  %v1479_v54 = vpack.c.bf16 %v1423_v52, %v1419_v51  ;;  %v1461_v51 = vld [vmem:[#allocation11 + $0x1a0] sm:$0xff]  ;;  %v1459_v52 = vld [vmem:[#allocation11 + $0x190] sm:$0xff] }
 0x78b   : > { %v2324_v57 = vpack.i.bf16 %v1130_v56, %v1127_v44  ;;  %v2165_v58 = vpop.f32.mrb[23].mxu1  ;;  %v1477_v44 = vpack.c.bf16 %v1421_v42, %v1417_v41  ;;  %v1430_v56 = vld [vmem:[#allocation11 + $0xa8] sm:$0xff]  ;;  %v1460_v41 = vld [vmem:[#allocation11 + $0x198] sm:$0xff] }
 0x78c   : > { %v1482_v58 = vpack.c.bf16 %v1430_v56, %v1426_v55  ;;  %v1464_v42 = vld [vmem:[#allocation11 + $0x1b8] sm:$0xff]  ;;  %v1466_v55 = vld [vmem:[#allocation11 + $0x1c8] sm:$0xff] }
 0x78d   : > { %2325 = vrot.lane.b32.xlu0 %v2324_v57, %s2685_s3  ;;  %v1428_v57 = vld [vmem:[#allocation11 + $0x98] sm:$0xff]  ;;  %v1470_v56 = vld [vmem:[#allocation11 + $0x1e8] sm:$0xff] }
 0x790   : > { %v1250_v59 = vpop.f32.mrb[24].mxu1 }
 0x791   : > { %v2176_v60 = vpop.f32.mrb[25].mxu1 }
 0x792   : > { %v1253_v61 = vpop.f32.mrb[26].mxu1  ;;  %v1425_v60 = vld [vmem:[#allocation11 + $0x80] sm:$0xff] }
 0x793   : > { %v2329_v62 = vpack.i.bf16 %v1253_v61, %v1250_v59  ;;  %v2177_v63 = vpop.f32.mrb[27].mxu1  ;;  %v1432_v59 = vld [vmem:[#allocation11 + $0xb8] sm:$0xff]  ;;  %v1429_v61 = vld [vmem:[#allocation11 + $0xa0] sm:$0xff] }
 0x794   : > { %v1481_v63 = vpack.c.bf16 %v1429_v61, %v1425_v60  ;;  %v1502_v61 = vpack.c.bf16 %v1470_v56, %v1466_v55 }
 0x795   : > { %2330 = vrot.lane.b32.xlu1 %v2329_v62, %s2684_s30  ;;  %v1484_v62 = vpack.c.bf16 %v1432_v59, %v1428_v57  ;;  %v1468_v57 = vld [vmem:[#allocation11 + $0x1d8] sm:$0xff]  ;;  %s3309_s30 = sld [smem:[#allocation24_spill]] }
 0x796   : > { %v1472_v59 = vld [vmem:[#allocation11 + $0x1f8] sm:$0xff] }
 0x7f7   : > { %v2321_v3 = vpop.permute.xlu1 %2320 }
 0x7f8   : > { %v2323_v0 = vunpack.i.h.bf16 %v2321_v3  ;;  %v2322_v8 = vunpack.i.l.bf16 %v2321_v3  ;;  %v1427_v3 = vld [vmem:[#allocation11 + $0x90] sm:$0xff] }
 0x7fa   : > { %v1282_v9 = vsel %vm767_vm1, %v3129_v53, %v2323_v0  ;;  %v1281_v10 = vsel %vm767_vm1, %v3127_v49, %v2322_v8  ;;  %v1434_v8 = vld [vmem:[#allocation11 + $0xc8] sm:$0xff] }
 0x7ff   : > { %v2326_v4 = vpop.permute.xlu0 %2325 }
 0x800   : > { %v2328_v5 = vunpack.i.h.bf16 %v2326_v4  ;;  %v2327_v6 = vunpack.i.l.bf16 %v2326_v4  ;;  %v1431_v4 = vld [vmem:[#allocation11 + $0xb0] sm:$0xff] }
 0x801   : > { %v1483_v0 = vpack.c.bf16 %v1431_v4, %v1427_v3  ;;  %v1504_v3 = vpack.c.bf16 %v1472_v59, %v1468_v57  ;;  %v1467_v4 = vld [vmem:[#allocation11 + $0x1d0] sm:$0xff]  ;;  %v1660_v57 = vld [vmem:[#allocation13 + $0x18] sm:$0xff] }
 0x802   : > { %v1285_v13 = vsel %vm1283_vm3, %v1282_v9, %v2328_v5  ;;  %v1284_v14 = vsel %vm1283_vm3, %v1281_v10, %v2327_v6  ;;  %v1438_v5 = vld [vmem:[#allocation11 + $0xe8] sm:$0xff]  ;;  %v1436_v6 = vld [vmem:[#allocation11 + $0xd8] sm:$0xff]  ;;  %v1433_v10 = vld [vmem:[#allocation11 + $0xc0] sm:$0xff] }
 0x803   : > { %v1440_v9 = vld [vmem:[#allocation11 + $0xf8] sm:$0xff] }
 0x804   : > { %v1692_v59 = vld [vmem:[#allocation13 + $0x118] sm:$0xff] }
 0x807   : > { %v2331_v7 = vpop.permute.xlu1 %2330 }
 0x808   : > { %v2333_v11 = vunpack.i.h.bf16 %v2331_v7  ;;  %v2332_v12 = vunpack.i.l.bf16 %v2331_v7  ;;  %v1486_v7 = vpack.c.bf16 %v1438_v5, %v1434_v8 }
 0x80a   : > { %v1288_v15 = vsel %vm1286_vm4, %v1285_v13, %v2333_v11  ;;  %v1287_v16 = vsel %vm1286_vm4, %v1284_v14, %v2332_v12  ;;  %v1437_v11 = vld [vmem:[#allocation11 + $0xe0] sm:$0xff]  ;;  %v1488_v12 = vpack.c.bf16 %v1440_v9, %v1436_v6  ;;  %v1435_v14 = vld [vmem:[#allocation11 + $0xd0] sm:$0xff] }
 0x80b   : > { %v1289_v17 = vpack.c.bf16 %v1288_v15, %v1287_v16  ;;  %v1485_v13 = vpack.c.bf16 %v1437_v11, %v1433_v10  ;;  %v1439_v15 = vld [vmem:[#allocation11 + $0xf0] sm:$0xff]  ;;  %v1673_v6 = vld [vmem:[#allocation13 + $0x80] sm:$0xff]  ;;  %v1706_v11 = vld [vmem:[#allocation13 + $0x188] sm:$0xff] }
 0x80c   : > { %v1487_v16 = vpack.c.bf16 %v1439_v15, %v1435_v14  ;;  %v1705_v9 = vld [vmem:[#allocation13 + $0x180] sm:$0xff] }
 0x80d   : > { %2195 = vmatmul.mubr.bf16.vlgmr.msra.gmra.mrb[12].mxu0 %v1289_v17  ;;  %v1442_v17 = vld [vmem:[#allocation11 + $0x108] sm:$0xff] }
 0x80e   : > { %1602 = vmatprep.mubr.bf16.mxu0 %v2682_v48  ;;  %1571 = vmatpush1.bf16.msra.mxu0 %v1475_v35 }
 0x80f   : > { %1572 = vmatprep.subr.bf16.mxu0 %v1480_v43  ;;  %v1457_v43 = vld [vmem:[#allocation11 + $0x180] sm:$0xff] }
 0x812   : > { %1573 = vmatpush1.bf16.msra.mxu0 %v1479_v54  ;;  %v1463_v54 = vld [vmem:[#allocation11 + $0x1b0] sm:$0xff] }
 0x813   : > { %1574 = vmatprep.subr.bf16.mxu0 %v1484_v62  ;;  %v1499_v60 = vpack.c.bf16 %v1463_v54, %v1459_v52  ;;  %v1465_v62 = vld [vmem:[#allocation11 + $0x1c0] sm:$0xff]  ;;  %v1659_v52 = vld [vmem:[#allocation13 + $0x10] sm:$0xff] }
 0x816   : > { %1575 = vmatpush1.bf16.msra.mxu0 %v1483_v0  ;;  %v1471_v0 = vld [vmem:[#allocation11 + $0x1f0] sm:$0xff] }
 0x817   : > { %1576 = vmatprep.subr.bf16.mxu0 %v1488_v12  ;;  %v1503_v5 = vpack.c.bf16 %v1471_v0, %v1467_v4  ;;  %v1745_v12 = vpack.c.bf16 %v1706_v11, %v1705_v9  ;;  %v1710_v0 = vld [vmem:[#allocation13 + $0x1a8] sm:$0xff] }
 0x81a   : > { %1577 = vmatpush1.bf16.msra.mxu0 %v1487_v16 }
 0x8e0   : > { %v1355_v19 = vpop.f32.mrb[12].mxu0 }
 0x8e1   : > { %v1356_v20 = vadd.f32 %v2021_v18, %v1355_v19  ;;  %v2196_v53 = vpop.f32.mrb[13].mxu0  ;;  %v1444_v19 = vld [vmem:[#allocation11 + $0x118] sm:$0xff] }
 0x8e2   : > { %v1358_v21 = vpop.f32.mrb[14].mxu0  ;;  %v1448_v53 = vld [vmem:[#allocation11 + $0x138] sm:$0xff] }
 0x8e3   : > { %v3178_v49 = vadd.f32 %v1356_v20, %v3048_v1  ;;  %v1359_v22 = vadd.f32 %v2021_v18, %v1358_v21  ;;  %v2197_v23 = vpop.f32.mrb[15].mxu0  ;;  %v1414_v1 = vld [vmem:[#allocation11 + $0x28] sm:$0xff]  ;;  %v1441_v21 = vld [vmem:[#allocation11 + $0x100] sm:$0xff] }
 0x8e4   : > { %v1474_v28 = vpack.c.bf16 %v1414_v1, %v1410_v26  ;;  %v1446_v18 = vld [vmem:[#allocation11 + $0x128] sm:$0xff]  ;;  %v1492_v23 = vpack.c.bf16 %v1448_v53, %v1444_v19  ;;  %v1447_v26 = vld [vmem:[#allocation11 + $0x130] sm:$0xff] }
 0x8e5   : > { %v3181_v24 = vadd.f32 %v1359_v22, %v3050_v2  ;;  %1366 = vadd.xlane.f32.xlu0 %v3178_v49  ;;  %v1372_v48 = vmul.f32 %v3178_v49, %v3178_v49  ;;  %v1413_v2 = vld [vmem:[#allocation11 + $0x20] sm:$0xff]  ;;  %v1490_v20 = vpack.c.bf16 %v1446_v18, %v1442_v17  ;;  %v1450_v1 = vld [vmem:[#allocation11 + $0x148] sm:$0xff] }
 0x8e6   : > { %v1473_v32 = vpack.c.bf16 %v1413_v2, %v1409_v30  ;;  %1527 = vmatprep.subr.bf16.mxu1 %v1474_v28  ;;  %v1445_v22 = vld [vmem:[#allocation11 + $0x120] sm:$0xff]  ;;  %v1454_v28 = vld [vmem:[#allocation11 + $0x168] sm:$0xff]  ;;  %v1456_v30 = vld [vmem:[#allocation11 + $0x178] sm:$0xff]  ;;  %1578 = vmatprep.subr.bf16.mxu0 %v1492_v23 }
 0x8e7   : > { %1368 = vadd.xlane.f32.xlu1 %v3181_v24  ;;  %v1373_v25 = vmul.f32 %v3181_v24, %v3181_v24  ;;  %v1494_v2 = vpack.c.bf16 %v1454_v28, %v1450_v1  ;;  %v1496_v31 = vpack.c.bf16 %v1456_v30, %v1452_v29  ;;  %v2022_v28 = vld [vmem:[%s3307_s23] ss:$0 sm:$0xff] }
 0x8e8   : > { %1528 = vmatpush1.bf16.msra.mxu1 %v1473_v32  ;;  %v1449_v32 = vld [vmem:[#allocation11 + $0x140] sm:$0xff] }
 0x8e9   : > { %1374 = vadd.xlane.f32.xlu0 %v1372_v48  ;;  %1529 = vmatprep.subr.bf16.mxu1 %v1478_v39  ;;  %v1489_v48 = vpack.c.bf16 %v1445_v22, %v1441_v21  ;;  %v1493_v35 = vpack.c.bf16 %v1453_v33, %v1449_v32  ;;  %v1495_v39 = vpack.c.bf16 %v1455_v36, %v1451_v34  ;;  %v2023_v32 = vld [vmem:[%s3308_s17] ss:$0 sm:$0xff]  ;;  %v1657_v33 = vld [vmem:[#allocation13] sm:$0xff]  ;;  %v1658_v34 = vld [vmem:[#allocation13 + $0x8] sm:$0xff]  ;;  %s3219_s17 = scalar_lea.hbm %s3311_s22, %s2031_s13 }
 0x8ea   : > { %v1689_v36 = vld [vmem:[#allocation13 + $0x100] sm:$0xff] }
 0x8ec   : > { %1530 = vmatpush1.bf16.msra.mxu1 %v1477_v44  ;;  %v1500_v44 = vpack.c.bf16 %v1464_v42, %v1460_v41  ;;  %v1708_v41 = vld [vmem:[#allocation13 + $0x198] sm:$0xff] }
 0x8ed   : > { %1376 = vadd.xlane.f32.xlu0 %v1373_v25  ;;  %1531 = vmatprep.subr.bf16.mxu1 %v1482_v58  ;;  %v1443_v25 = vld [vmem:[#allocation11 + $0x110] sm:$0xff]  ;;  %v1497_v58 = vpack.c.bf16 %v1461_v51, %v1457_v43  ;;  %v1737_v51 = vpack.c.bf16 %v1690_v37, %v1689_v36  ;;  %v1716_v37 = vld [vmem:[#allocation13 + $0x1d8] sm:$0xff] }
 0x8ee   : > { %v1491_v27 = vpack.c.bf16 %v1447_v26, %v1443_v25 }
 0x8f0   : > { %1532 = vmatpush1.bf16.msra.mxu1 %v1481_v63  ;;  %1579 = vmatpush1.bf16.msra.mxu0 %v1491_v27  ;;  %v1469_v63 = vld [vmem:[#allocation11 + $0x1e0] sm:$0xff] }
 0x8f1   : > { %1533 = vmatprep.subr.bf16.mxu1 %v1486_v7  ;;  %1580 = vmatprep.subr.bf16.mxu0 %v1496_v31  ;;  %v1501_v8 = vpack.c.bf16 %v1469_v63, %v1465_v62  ;;  %v1674_v7 = vld [vmem:[#allocation13 + $0x88] sm:$0xff]  ;;  %v1677_v62 = vld [vmem:[#allocation13 + $0xa0] sm:$0xff] }
 0x8f2   : > { %v1729_v10 = vpack.c.bf16 %v1674_v7, %v1673_v6  ;;  %v1678_v63 = vld [vmem:[#allocation13 + $0xa8] sm:$0xff]  ;;  %v1693_v7 = vld [vmem:[#allocation13 + $0x120] sm:$0xff] }
 0x8f3   : > { %v1731_v4 = vpack.c.bf16 %v1678_v63, %v1677_v62  ;;  %v1662_v6 = vld [vmem:[#allocation13 + $0x28] sm:$0xff] }
 0x8f4   : > { %1534 = vmatpush1.bf16.msra.mxu1 %v1485_v13  ;;  %1581 = vmatpush1.bf16.msra.mxu0 %v1495_v39  ;;  %v1676_v39 = vld [vmem:[#allocation13 + $0x98] sm:$0xff]  ;;  %v1702_v62 = vld [vmem:[#allocation13 + $0x168] sm:$0xff] }
 0x8f5   : > { %1535 = vmatprep.subr.bf16.mxu1 %v1490_v20  ;;  %1582 = vmatprep.subr.bf16.mxu0 %v1500_v44  ;;  %v1721_v44 = vpack.c.bf16 %v1658_v34, %v1657_v33  ;;  %v1730_v55 = vpack.c.bf16 %v1676_v39, %v1675_v38  ;;  %v1683_v33 = vld [vmem:[#allocation13 + $0xd0] sm:$0xff]  ;;  %v1684_v34 = vld [vmem:[#allocation13 + $0xd8] sm:$0xff] }
 0x8f6   : > { %v1734_v36 = vpack.c.bf16 %v1684_v34, %v1683_v33  ;;  %v1667_v38 = vld [vmem:[#allocation13 + $0x50] sm:$0xff]  ;;  %v1668_v39 = vld [vmem:[#allocation13 + $0x58] sm:$0xff] }
 0x8f8   : > { %1536 = vmatpush1.bf16.msra.mxu1 %v1489_v48  ;;  %1583 = vmatpush1.bf16.msra.mxu0 %v1499_v60  ;;  %v1722_v60 = vpack.c.bf16 %v1660_v57, %v1659_v52  ;;  %v1686_v52 = vld [vmem:[#allocation13 + $0xe8] sm:$0xff]  ;;  %v1669_v57 = vld [vmem:[#allocation13 + $0x60] sm:$0xff] }
 0x8f9   : > { %1537 = vmatprep.subr.bf16.mxu1 %v1494_v2  ;;  %1584 = vmatprep.subr.bf16.mxu0 %v1504_v3  ;;  %v1709_v3 = vld [vmem:[#allocation13 + $0x1a0] sm:$0xff] }
 0x8fc   : > { %1538 = vmatpush1.bf16.msra.mxu1 %v1493_v35  ;;  %1585 = vmatpush1.bf16.msra.mxu0 %v1503_v5  ;;  %v1661_v5 = vld [vmem:[#allocation13 + $0x20] sm:$0xff] }
 0x8fd   : > { %1539 = vmatprep.subr.bf16.mxu1 %v1498_v40  ;;  %2088 = vmatprep.subr.bf16.mxu0 %v1745_v12  ;;  %v1707_v40 = vld [vmem:[#allocation13 + $0x190] sm:$0xff]  ;;  %v1723_v9 = vpack.c.bf16 %v1662_v6, %v1661_v5  ;;  %v1720_v5 = vld [vmem:[#allocation13 + $0x1f8] sm:$0xff] }
 0x8fe   : > { %v1746_v56 = vpack.c.bf16 %v1708_v41, %v1707_v40  ;;  %v1679_v12 = vld [vmem:[#allocation13 + $0xb0] sm:$0xff]  ;;  %v1726_v41 = vpack.c.bf16 %v1668_v39, %v1667_v38 }
 0x8ff   : > { %v1671_v6 = vld [vmem:[#allocation13 + $0x70] sm:$0xff] }
 0x900   : > { %1540 = vmatpush1.bf16.msra.mxu1 %v1497_v58  ;;  %v1691_v58 = vld [vmem:[#allocation13 + $0x110] sm:$0xff] }
 0x901   : > { %1541 = vmatprep.subr.bf16.mxu1 %v1502_v61  ;;  %v1738_v61 = vpack.c.bf16 %v1692_v59, %v1691_v58  ;;  %v1670_v58 = vld [vmem:[#allocation13 + $0x68] sm:$0xff] }
 0x904   : > { %1542 = vmatpush1.bf16.msra.mxu1 %v1501_v8  ;;  %v1747_v8 = vpack.c.bf16 %v1710_v0, %v1709_v3  ;;  %v1687_v3 = vld [vmem:[#allocation13 + $0xf0] sm:$0xff] }
 0x905   : > { %2066 = vmatprep.subr.bf16.mxu1 %v1729_v10  ;;  %v1694_v10 = vld [vmem:[#allocation13 + $0x128] sm:$0xff]  ;;  %v1719_v0 = vld [vmem:[#allocation13 + $0x1f0] sm:$0xff] }
 0x906   : > { %v1739_v11 = vpack.c.bf16 %v1694_v10, %v1693_v7  ;;  %v1672_v7 = vld [vmem:[#allocation13 + $0x78] sm:$0xff] }
 0x907   : > { %v1728_v10 = vpack.c.bf16 %v1672_v7, %v1671_v6 }
 0x972   : > { %v1367_v13 = vpop.xlane.xlu0 %1366 }
 0x973   : > { %v1370_v14 = vmul.f32 0.0078125, %v1367_v13  ;;  %v1680_v13 = vld [vmem:[#allocation13 + $0xb8] sm:$0xff] }
 0x974   : > { %v1369_v15 = vpop.xlane.xlu1 %1368 }
 0x975   : > { %v1380_v17 = vmul.f32 %v1370_v14, %v1370_v14  ;;  %v1371_v18 = vmul.f32 0.0078125, %v1369_v15  ;;  %v1384_v26 = vsub.f32 %v3178_v49, %v1370_v14  ;;  %v1711_v14 = vld [vmem:[#allocation13 + $0x1b0] sm:$0xff]  ;;  %v1732_v15 = vpack.c.bf16 %v1680_v13, %v1679_v12  ;;  %v1704_v12 = vld [vmem:[#allocation13 + $0x178] sm:$0xff] }
 0x976   : > { %v1375_v16 = vpop.xlane.xlu0 %1374 }
 0x977   : > { %v1378_v19 = vmul.f32 0.0078125, %v1375_v16  ;;  %v1381_v21 = vmul.f32 %v1371_v18, %v1371_v18  ;;  %v1385_v29 = vsub.f32 %v3181_v24, %v1371_v18  ;;  %v1712_v16 = vld [vmem:[#allocation13 + $0x1b8] sm:$0xff] }
 0x978   : > { %v1664_v18 = vld [vmem:[#allocation13 + $0x38] sm:$0xff] }
 0x979   : > { %v1382_v20 = vsub.f32 %v1378_v19, %v1380_v17  ;;  %v1663_v17 = vld [vmem:[#allocation13 + $0x30] sm:$0xff]  ;;  %v1748_v19 = vpack.c.bf16 %v1712_v16, %v1711_v14  ;;  %v1505_v14 = vld [vmem:[%s3309_s30] sm:$0xf]  ;;  %s2594_s30 = scalar_lea.vmem %s2593_s24, 512 }
 0x97a   : > { %v1377_v53 = vpop.xlane.xlu0 %1376  ;;  %v1510_v16 = vrot.slane %v1505_v14, %v667_v46  ;;  %p2596_p3 = scmp.lt.s32.totalorder %s2594_s30, %s2588_s15 }
 0x97b   : > { %v1386_v22 = vadd.f32 1e-06, %v1382_v20  ;;  %v1379_v23 = vmul.f32 0.0078125, %v1377_v53  ;;  %v1724_v20 = vpack.c.bf16 %v1664_v18, %v1663_v17  ;;  %v1695_v53 = vld [vmem:[#allocation13 + $0x130] sm:$0xff]  ;;  %v1518_v17 = vrot.slane %v1505_v14, %v675_v47 }
 0x97c   : > { %v1514_v18 = vrot.slane %v1505_v14, %v671_v50  ;;  %p2597_p2 = por %p2596_p3, %p2595_p1 }
 0x97d   : > { %2370 = vrsqrt.f32 %v1386_v22  ;;  %v1383_v48 = vsub.f32 %v1379_v23, %v1381_v21  ;;  %v1696_v21 = vld [vmem:[#allocation13 + $0x138] sm:$0xff]  ;;  %v1681_v23 = vld [vmem:[#allocation13 + $0xc0] sm:$0xff] }
 0x97e   : > { %v1740_v22 = vpack.c.bf16 %v1696_v21, %v1695_v53  ;;  %p2598_p8 = pnand %p2597_p2, %p2591_p13 }
 0x97f   : > { %v1387_v25 = vadd.f32 1e-06, %v1383_v48  ;;  %v1682_v48 = vld [vmem:[#allocation13 + $0xc8] sm:$0xff] }
 0x981   : > { %2372 = vrsqrt.f32 %v1387_v25  ;;  %v1713_v25 = vld [vmem:[#allocation13 + $0x1c0] sm:$0xff] }
 0x987   : > { %v2371_v1 = vpop.eup %2370 }
 0x988   : > { %v1390_v27 = vmul.f32 %v2371_v1, %v1384_v26  ;;  %v1733_v26 = vpack.c.bf16 %v1682_v48, %v1681_v23  ;;  %v1714_v1 = vld [vmem:[#allocation13 + $0x1c8] sm:$0xff] }
 0x98a   : > { %v1398_v31 = vmul.f32 %v2022_v28, %v1390_v27  ;;  %v1665_v27 = vld [vmem:[#allocation13 + $0x40] sm:$0xff] }
 0x98b   : > { %v2373_v30 = vpop.eup %2372 }
 0x98c   : > { %v1391_v2 = vmul.f32 %v2373_v30, %v1385_v29  ;;  %v1406_v42 = vadd.f32 %v2023_v32, %v1398_v31  ;;  %v1749_v29 = vpack.c.bf16 %v1714_v1, %v1713_v25  ;;  %v1698_v31 = vld [vmem:[#allocation13 + $0x148] sm:$0xff] }
 0x98e   : > { %v1399_v35 = vmul.f32 %v2022_v28, %v1391_v2  ;;  %v1666_v28 = vld [vmem:[#allocation13 + $0x48] sm:$0xff]  ;;  %v1697_v2 = vld [vmem:[#allocation13 + $0x140] sm:$0xff] }
 0x98f   : > { %v1725_v30 = vpack.c.bf16 %v1666_v28, %v1665_v27 }
 0x990   : > { %v1407_v43 = vadd.f32 %v2023_v32, %v1399_v35  ;;  %v1741_v32 = vpack.c.bf16 %v1698_v31, %v1697_v2  ;;  %v1715_v35 = vld [vmem:[#allocation13 + $0x1d0] sm:$0xff] }
 0x991   : > { %v1750_v40 = vpack.c.bf16 %v1716_v37, %v1715_v35 }
 0x992   : > { %v1408_v54 = vpack.c.bf16 %v1407_v43, %v1406_v42  ;;  %v1699_v42 = vld [vmem:[#allocation13 + $0x150] sm:$0xff]  ;;  %v1700_v43 = vld [vmem:[#allocation13 + $0x158] sm:$0xff] }
 0x994   : > { %1560 = vmatmul.mubr.bf16.vlgmr.msra.gmra.mrb[28].mxu1 %v1408_v54  ;;  %1603 = vmatmul.mubr.bf16.vlgmr.msra.gmra.mrb[16].mxu0 %v1408_v54  ;;  %v1717_v54 = vld [vmem:[#allocation13 + $0x1e0] sm:$0xff] }
 0x995   : > { %2067 = vmatpush3.bf16.msra.mxu1 %v1721_v44  ;;  %2089 = vmatpush3.bf16.msra.mxu0 %v1737_v51  ;;  %v1742_v44 = vpack.c.bf16 %v1700_v43, %v1699_v42  ;;  %v1685_v51 = vld [vmem:[#allocation13 + $0xe0] sm:$0xff] }
 0x996   : > { %2068 = vmatprep.subr.bf16.mxu1 %v1730_v55  ;;  %2090 = vmatprep.subr.bf16.mxu0 %v1746_v56  ;;  %v1735_v55 = vpack.c.bf16 %v1686_v52, %v1685_v51  ;;  %v1718_v56 = vld [vmem:[#allocation13 + $0x1e8] sm:$0xff] }
 0x997   : > { %v1751_v59 = vpack.c.bf16 %v1718_v56, %v1717_v54 }
 0x999   : > { %2069 = vmatpush3.bf16.msra.mxu1 %v1722_v60  ;;  %2091 = vmatpush3.bf16.msra.mxu0 %v1738_v61  ;;  %v1727_v60 = vpack.c.bf16 %v1670_v58, %v1669_v57  ;;  %v1701_v61 = vld [vmem:[#allocation13 + $0x160] sm:$0xff] }
 0x99a   : > { %2070 = vmatprep.subr.bf16.mxu1 %v1731_v4  ;;  %2092 = vmatprep.subr.bf16.mxu0 %v1747_v8  ;;  %v1743_v63 = vpack.c.bf16 %v1702_v62, %v1701_v61  ;;  %v1688_v4 = vld [vmem:[#allocation13 + $0xf8] sm:$0xff] }
 0x99b   : > { %v1736_v8 = vpack.c.bf16 %v1688_v4, %v1687_v3 }
 0x99d   : > { %2071 = vmatpush3.bf16.msra.mxu1 %v1723_v9  ;;  %2093 = vmatpush3.bf16.msra.mxu0 %v1739_v11  ;;  %v1752_v9 = vpack.c.bf16 %v1720_v5, %v1719_v0  ;;  %v1703_v11 = vld [vmem:[#allocation13 + $0x170] sm:$0xff] }
 0x99e   : > { %2072 = vmatprep.subr.bf16.mxu1 %v1732_v15  ;;  %2094 = vmatprep.subr.bf16.mxu0 %v1748_v19  ;;  %v1744_v13 = vpack.c.bf16 %v1704_v12, %v1703_v11  ;;  %v1521_v15 = vsub.s32 3, %v3076_v45 }
 0x9a0   : > { %v1522_v19 = vrot.slane %v1505_v14, %v1521_v15 }
 0x9a1   : > { %2073 = vmatpush3.bf16.msra.mxu1 %v1724_v20  ;;  %2095 = vmatpush3.bf16.msra.mxu0 %v1740_v22 }
 0x9a2   : > { %2074 = vmatprep.subr.bf16.mxu1 %v1733_v26  ;;  %2096 = vmatprep.subr.bf16.mxu0 %v1749_v29 }
 0x9a5   : > { %2075 = vmatpush3.bf16.msra.mxu1 %v1725_v30  ;;  %2097 = vmatpush3.bf16.msra.mxu0 %v1741_v32 }
 0x9a6   : > { %2076 = vmatprep.subr.bf16.mxu1 %v1734_v36  ;;  %2098 = vmatprep.subr.bf16.mxu0 %v1750_v40 }
 0x9a9   : > { %2077 = vmatpush3.bf16.msra.mxu1 %v1726_v41  ;;  %2099 = vmatpush3.bf16.msra.mxu0 %v1742_v44 }
 0x9aa   : > { %2078 = vmatprep.subr.bf16.mxu1 %v1735_v55  ;;  %2100 = vmatprep.subr.bf16.mxu0 %v1751_v59 }
 0x9ad   : > { %2079 = vmatpush3.bf16.msra.mxu1 %v1727_v60  ;;  %2101 = vmatpush3.bf16.msra.mxu0 %v1743_v63 }
 0x9ae   : > { %2080 = vmatprep.subr.bf16.mxu1 %v1736_v8  ;;  %2102 = vmatprep.subr.bf16.mxu0 %v1752_v9 }
 0x9b1   : > { %2081 = vmatpush3.bf16.msra.mxu1 %v1728_v10  ;;  %2103 = vmatpush3.bf16.msra.mxu0 %v1744_v13 }
 0xa67   : > { %v1561_v20 = vpop.f32.mrb[28].mxu1  ;;  %v1604_v53 = vpop.f32.mrb[16].mxu0 }
 0xa68   : > { %v1562_v21 = vadd.f32 %v1561_v20, %v1510_v16  ;;  %v1605_v22 = vadd.f32 %v1604_v53, %v1518_v17  ;;  %v1563_v23 = vpop.f32.mrb[29].mxu1  ;;  %v1606_v48 = vpop.f32.mrb[17].mxu0  ;;  %v2024_v20 = vld [vmem:[%s3310_s18] ss:$0 sm:$0xff] }
 0xa69   : > { %v1564_v25 = vadd.f32 %v1563_v23, %v1514_v18  ;;  %v1607_v26 = vadd.f32 %v1606_v48, %v1522_v19  ;;  %v1565_v1 = vpop.f32.mrb[30].mxu1  ;;  %v1608_v27 = vpop.f32.mrb[18].mxu0 }
 0xa6a   : > { %v1621_v28 = vmul.f32 0.70710677, %v1562_v21  ;;  %v1623_v29 = vmul.f32 0.70710677, %v1605_v22  ;;  %v1566_v47 = vadd.f32 %v1565_v1, %v1510_v16  ;;  %v1609_v2 = vadd.f32 %v1608_v27, %v1518_v17  ;;  %v1567_v45 = vpop.f32.mrb[31].mxu1  ;;  %v1610_v50 = vpop.f32.mrb[19].mxu0 }
 0xa6b   : > { %v1622_v46 = vmul.f32 0.70710677, %v1564_v25  ;;  %v1624_v30 = vmul.f32 0.70710677, %v1607_v26  ;;  %v1568_v31 = vadd.f32 %v1567_v45, %v1514_v18  ;;  %v1611_v32 = vadd.f32 %v1610_v50, %v1522_v19 }
 0xa6c   : > { %2374 = verf.f32 %v1621_v28  ;;  %v1625_v33 = vmul.f32 0.70710677, %v1566_v47  ;;  %v1627_v34 = vmul.f32 0.70710677, %v1609_v2  ;;  %v1613_v43 = vmul.f32 0.5, %v1562_v21 }
 0xa6d   : > { %2376 = verf.f32 %v1623_v29  ;;  %v1626_v35 = vmul.f32 0.70710677, %v1568_v31  ;;  %v1628_v36 = vmul.f32 0.70710677, %v1611_v32  ;;  %v1615_v44 = vmul.f32 0.5, %v1605_v22 }
 0xa6e   : > { %2378 = verf.f32 %v1622_v46  ;;  %v1614_v54 = vmul.f32 0.5, %v1564_v25  ;;  %v1617_v56 = vmul.f32 0.5, %v1566_v47  ;;  %v1616_v59 = vmul.f32 0.5, %v1607_v26 }
 0xa6f   : > { %2380 = verf.f32 %v1624_v30  ;;  %v1619_v61 = vmul.f32 0.5, %v1609_v2  ;;  %v1618_v0 = vmul.f32 0.5, %v1568_v31  ;;  %v1620_v7 = vmul.f32 0.5, %v1611_v32 }
 0xa70   : > { %2382 = verf.f32 %v1625_v33 }
 0xa71   : > { %2384 = verf.f32 %v1627_v34 }
 0xa72   : > { %2386 = verf.f32 %v1626_v35 }
 0xa73   : > { %2388 = verf.f32 %v1628_v36 }
 0xa76   : > { %v2375_v37 = vpop.eup %2374 }
 0xa77   : > { %v2377_v38 = vpop.eup %2376  ;;  %v1637_v41 = vadd.f32 1.0, %v2375_v37 }
 0xa78   : > { %v2379_v39 = vpop.eup %2378  ;;  %v1639_v51 = vadd.f32 1.0, %v2377_v38 }
 0xa79   : > { %v2381_v40 = vpop.eup %2380  ;;  %v1638_v55 = vadd.f32 1.0, %v2379_v39  ;;  %v1645_v3 = vmul.f32 %v1637_v41, %v1613_v43 }
 0xa7a   : > { %v2383_v42 = vpop.eup %2382  ;;  %v1640_v60 = vadd.f32 1.0, %v2381_v40  ;;  %v1647_v5 = vmul.f32 %v1639_v51, %v1615_v44 }
 0xa7b   : > { %v2385_v52 = vpop.eup %2384  ;;  %v1641_v57 = vadd.f32 1.0, %v2383_v42  ;;  %v1646_v10 = vmul.f32 %v1638_v55, %v1614_v54 }
 0xa7c   : > { %v2387_v58 = vpop.eup %2386  ;;  %v1643_v62 = vadd.f32 1.0, %v2385_v52  ;;  %v1648_v13 = vmul.f32 %v1640_v60, %v1616_v59 }
 0xa7d   : > { %v2389_v63 = vpop.eup %2388  ;;  %v1649_v4 = vmul.f32 %v1641_v57, %v1617_v56  ;;  %v1642_v8 = vadd.f32 1.0, %v2387_v58 }
 0xa7e   : > { %v1651_v6 = vmul.f32 %v1643_v62, %v1619_v61  ;;  %v1644_v9 = vadd.f32 1.0, %v2389_v63 }
 0xa7f   : > { %v1653_v11 = vpack.c.bf16 %v1649_v4, %v1645_v3  ;;  %v1650_v12 = vmul.f32 %v1642_v8, %v1618_v0 }
 0xa80   : > { %v1655_v14 = vpack.c.bf16 %v1651_v6, %v1647_v5  ;;  %v1652_v15 = vmul.f32 %v1644_v9, %v1620_v7 }
 0xa81   : > { %v1654_v16 = vpack.c.bf16 %v1650_v12, %v1646_v10 }
 0xa82   : > { %v1656_v17 = vpack.c.bf16 %v1652_v15, %v1648_v13 }
 0xa83   : > { %1792 = vmatprep.mubr.bf16.mxu1 %v1654_v16 }
 0xa84   : > { %1833 = vmatprep.mubr.bf16.mxu0 %v1656_v17  ;;  %1793 = vmatmul.mubr.bf16.vlgmr.msra.gmra.mrb[32].mxu1 %v1653_v11 }
 0xa85   : > { %1834 = vmatmul.mubr.bf16.vlgmr.msra.gmra.mrb[20].mxu0 %v1655_v14 }
 0xb57   : > { %v2082_v18 = vpop.f32.mrb[32].mxu1 }
 0xb58   : > { %v2104_v19 = vpop.f32.mrb[20].mxu0  ;;  %v2083_v53 = vpop.f32.mrb[33].mxu1 }
 0xb59   : > { %v2084_v21 = vadd.f32 %v2083_v53, %v2082_v18  ;;  %v2105_v22 = vpop.f32.mrb[21].mxu0  ;;  %v2085_v23 = vpop.f32.mrb[34].mxu1 }
 0xb5a   : > { %v2106_v48 = vadd.f32 %v2105_v22, %v2104_v19  ;;  %v2107_v25 = vpop.f32.mrb[22].mxu0  ;;  %v2086_v26 = vpop.f32.mrb[35].mxu1 }
 0xb5b   : > { %v1795_v1 = vadd.f32 %v2084_v21, %v2024_v20  ;;  %v2087_v27 = vadd.f32 %v2086_v26, %v2085_v23  ;;  %v2108_v28 = vpop.f32.mrb[23].mxu0 }
 0xb5c   : > { %v2109_v29 = vadd.f32 %v2108_v28, %v2107_v25 }
 0xb5d   : > { %v1836_v46 = vadd.f32 %v2106_v48, %v1795_v1  ;;  %v1798_v30 = vadd.f32 %v2087_v27, %v2024_v20 }
 0xb5f   : > { %v1842_v47 = vadd.f32 %v1836_v46, %v3178_v49  ;;  %v1839_v2 = vadd.f32 %v2109_v29, %v1798_v30 }
 0xb61   : > { %1844 = vst [vmem:[%s541_s20] sm:$0xff] %v1842_v47  ;;  %v1843_v45 = vadd.f32 %v1839_v2, %v3181_v24 }
 0xb63   : > { %1845 = vst [vmem:[%s541_s20 + $0x8] sm:$0xff] %v1843_v45 }
 0xb64   : > { %2601 = shalt.err (!%p2598_p8)
}
 0xb65   : > { %s2602_s3 = scalar_lea.hbm %s3219_s17, 256  ;;  %s2606_s20 = scalar_lea.hbm %s3311_s22, 512 }
 0xb66   : > { %p2603_p10 = scmp.ne.s32.totalorder %s3219_s17, %s2602_s3  ;;  %p2607_p0 = scmp.lt.u32.totalorder %s3219_s17, %s3311_s22 }
 0xb67   : > { %p2608_p5 = scmp.lt.u32.totalorder %s2606_s20, %s2602_s3  ;;  %p2610_p6 = scmp.lt.u32.totalorder %s2602_s3, %s3219_s17 }
 0xb68   : > { %p2604_p11 = pnand %p2603_p10, %p3312_p9 }
 0xb69   : > { %p2609_p7 = por %p2608_p5, %p2607_p0 }
 0xb6a   : > { %p2605_p12 = pneg %p2604_p11 }
 0xb6b   : > { %p2611_p4 = por %p2610_p6, %p2609_p7 }
 0xb6d   : > { %p2612_p13 = pnand %p2611_p4, %p2605_p12 }
 0xb6f   : > { %2615 = shalt.err (!%p2612_p13)
}
 0xb70   : > { %s2688_s19 = smov 128   ;;  %s2689_s15 = smov 8  }
 0xb71   : > { %2224 = dma.vmem_to_hbm [thread:$0]  (%p3312_p9), %s3214_s7, 256, %s3219_s17, %s1847_s1, %s2688_s19, %s2688_s19, %s2689_s15  }
 0xb72 PF: > { %s1875_s14 = sand.u32 1, %s2654_s25   ;;  %p3313_p1 = scmp.ne.s32.totalorder %s3298_s12, 0 }
 0xb73   : > { %p3314_p3 = scmp.ge.s32.totalorder %s2666_s28, 2  ;;  %s1876_s24 = scalar_lea.sflag [#allocation4], %s1875_s14 }
 0xb75   : > { %p2250_p2 = pnand %p3314_p3, %p3313_p1 }
 0xb77   : > { %2649 = dma.done.wait (!%p2250_p2), %s1876_s24, 256  }
 0xb78   : > { %2651 = vsyncadd (!%p2250_p2), %s1876_s24, 4294967040  ;;  %p29_p8 = scmp.ge.s32.totalorder %s2943_s16, 4   ;;  %s3315_s25 = smov %s2658_s26 }
 0xb79   : > { %s3316_s26 = smov %s2662_s27  ;;  %s3317_s27 = smov %s2954_s10 }
 0xb7a   : > { %s3318_s28 = smov %s2943_s16  ;;  %31 = sbr.rel (!%p29_p8) target bundleno = 16 (0x10), region = 141 }
 0xb81   :  { %1881 = vsyncpa [#allocation3], 1 }
 0xb82   :  { %1883 = vsyncpa [#allocation3 + $0x1], 1 }
 0xb83   :  { %1884 = vsyncpa [#allocation6], 1 }
 0xb84   :  { %1885 = vsyncpa [#allocation9], 1 }
 0xb85   :  { %1886 = vsyncpa [#allocation12], 1 }
 0xb86   :  { %1887 = vsyncpa [#allocation4], 1 }
 0xb87   :  { %1889 = vsyncpa [#allocation4 + $0x1], 1 }

</bundles_post_ra>
